<compile_context>
chip_gen: v6e
topology: v6e:2x2x1
jax: 0.10.0
libtpu: 0.0.40
codegen_flags: <defaults>
</compile_context>

<pallas_src>
import functools

import jax
import jax.numpy as jnp
from jax import lax
from jax.experimental import pallas as pl
from jax.experimental.pallas import tpu as pltpu


def _dcn1d_kernel(x_ref, wdw_ref, bdw_ref, lng_ref, lnb_ref,
                  woff_ref, boff_ref, wdef_ref, o_ref,
                  off_ref, z_ref,
                  *, C, O, O_pad, L, K, TL, W_TOT, stride, padding, dilation,
                  pad_dw, eps, off_clamp, m_dtype):
    t = pl.program_id(1)

    # ---------- per-batch stage (runs once per batch element, at tile 0) ----------
    @pl.when(t == 0)
    def _():
        x = x_ref[...].astype(jnp.float32)                    # (C, L)
        wdw = wdw_ref[...]                                    # (C, K)
        lane = lax.broadcasted_iota(jnp.int32, (1, L), 1)

        # depthwise conv (groups=C, 'same' padding) via lane rolls + boundary masks
        acc = jnp.zeros((C, L), jnp.float32)
        for k in range(K):
            sh = pad_dw - k                                   # roll-right amount
            if sh == 0:
                xs = x
            else:
                xs = pltpu.roll(x, shift=sh % L, axis=1)
                if sh > 0:
                    xs = jnp.where(lane >= sh, xs, 0.0)       # wrapped cols -> 0
                else:
                    xs = jnp.where(lane < L + sh, xs, 0.0)
            acc = acc + wdw[:, k:k + 1] * xs
        acc = acc + bdw_ref[...]                              # conv bias (C, 1)

        # LayerNorm over channels + ReLU, staying in (C, L) layout (no transpose)
        mu = jnp.mean(acc, axis=0, keepdims=True)
        var = jnp.mean((acc - mu) * (acc - mu), axis=0, keepdims=True)
        hn = (acc - mu) * lax.rsqrt(var + eps)
        hn = hn * lng_ref[...] + lnb_ref[...]
        hn = jnp.maximum(hn, 0.0)                             # (C, L)

        # offsets, transposed / lane-dense: (GK, L); clamp so the banded window is exact
        off = (jnp.dot(woff_ref[...], hn, preferred_element_type=jnp.float32)
               + boff_ref[...])
        if off_clamp is not None:
            off = jnp.clip(off, -off_clamp, off_clamp)
        off_ref[...] = off

        # z = wdef_flat @ x -> (K*O_pad, L); collapses the C contraction once per batch
        z_ref[...] = jnp.dot(
            wdef_ref[...], x_ref[...].astype(wdef_ref.dtype),
            preferred_element_type=jnp.float32).astype(z_ref.dtype)

    # ---------------------- per-tile deformable sampling --------------------------
    t0 = pl.multiple_of(t * TL, TL)                           # first output column
    if W_TOT == L:                                            # full input window
        start = 0
    else:                                                     # banded input window
        halo = (W_TOT - TL) // 2
        start = pl.multiple_of(jnp.clip(t0 - halo, 0, L - W_TOT), 128)

    # hat-interp weights: m_k[j, i] = relu(1 - |j - s(p=t0+i, k)|), zero padding.
    # Shared (W_TOT, 1) column iota; per-tap (1, TL) row vector with start / t0*stride /
    # padding / k*dilation folded in -> one full-size f32 subtract per tap before abs.
    jcol = lax.broadcasted_iota(jnp.int32, (W_TOT, 1), 0).astype(jnp.float32)
    irow = lax.broadcasted_iota(jnp.int32, (1, TL), 1).astype(jnp.float32)
    if stride != 1:
        irow = irow * float(stride)
    base = (t0 * stride - padding - start)                    # traced int scalar

    off_tile = off_ref[:, pl.ds(t0, TL)]                      # (GK, TL) f32
    y = jnp.zeros((O_pad, TL), jnp.float32)
    for k in range(K):
        bk = (base + k * dilation).astype(jnp.float32)        # scalar
        q_k = off_tile[k:k + 1, :] + (irow + bk)              # (1, TL) f32, cheap
        # position subtract in f32 (bf16 cannot hold indices > 256 exactly), then the
        # abs / 1- / max passes in m_dtype (bf16 on v6e/v7x -> half vreg traffic).
        d_k = (jcol - q_k).astype(m_dtype)                    # (W_TOT, TL)
        m_k = jnp.maximum(1.0 - jnp.abs(d_k), 0.0)
        zk = z_ref[pl.ds(k * O_pad, O_pad), pl.ds(start, W_TOT)]   # (O_pad, W_TOT)
        y = y + jnp.dot(zk, m_k.astype(z_ref.dtype),
                        preferred_element_type=jnp.float32)
    y_out = y if O_pad == O else y[:O, :]
    o_ref[...] = y_out.astype(o_ref.dtype)


def deformable_conv1d(x, params, *, kernel_size=3, stride=1, padding=1,
                      dilation=1, groups=1, tile_l=128, band_halo=None,
                      use_bf16=True, m_in_bf16=None, vmem_limit_bytes=None):
    w_dw, b_dw, ln_g, ln_b, w_off, b_off, w_def = params
    B, C, L = x.shape
    O = w_def.shape[0]
    K = kernel_size
    GK = w_off.shape[0]
    pad_dw = (K - 1) // 2

    # TODO(synk): deformable groups > 1 (per-group offsets) not implemented.
    assert groups == 1 and GK == groups * K, "only groups == 1 is supported"
    l_out = (L + 2 * padding - dilation * (K - 1) - 1) // stride + 1
    assert l_out == L, ("the offset head emits one offset per input position, so the "
                        "deformable conv must keep 'same' geometry (stride=1)")

    # ---- output-L tiling: keep TL small (128); per-tap work ~ K*L*(TL + 2*halo) ----
    if tile_l is not None and 0 < tile_l < L and L % tile_l == 0 and tile_l % 128 == 0:
        TL = tile_l
    else:
        TL = L
    T = L // TL

    # ---- banded interpolation window: DEFAULT ON, exact because offsets are clamped ----
    aligned = (L % 128 == 0 and TL % 128 == 0 and TL < L)
    if band_halo is None:
        band_halo = 128 if aligned else 0
    if band_halo > 0:
        band_halo = ((band_halo + 127) // 128) * 128          # lane-aligned halo
    off_clamp = None
    W_TOT = L
    if aligned and band_halo > 0 and TL + 2 * band_halo < L:
        clamp = band_halo - padding - (K - 1) * dilation - 1
        if clamp > 0:
            W_TOT = TL + 2 * band_halo
            off_clamp = float(clamp)

    mx_dtype = jnp.bfloat16 if use_bf16 else jnp.float32
    if m_in_bf16 is None:
        m_in_bf16 = use_bf16          # note: on v5e prefer m_in_bf16=False (no bf16 VALU)
    m_dtype = jnp.bfloat16 if m_in_bf16 else jnp.float32

    O_pad = ((O + 7) // 8) * 8        # sublane-aligned per-tap row blocks of z

    # ---- glue: reshape params into kernel-friendly layouts (no host-side pad of x) ----
    wdw2 = w_dw.reshape(C, K).astype(jnp.float32)       # (C, 1, K) -> (C, K)
    bdw2 = b_dw.reshape(C, 1).astype(jnp.float32)
    lng2 = ln_g.reshape(C, 1).astype(jnp.float32)
    lnb2 = ln_b.reshape(C, 1).astype(jnp.float32)
    woff2 = w_off.reshape(GK, C).astype(jnp.float32)
    boff2 = b_off.reshape(GK, 1).astype(jnp.float32)
    # (O, C, K) -> (K, O, C), zero-pad O -> O_pad, flatten to (K*O_pad, C) so
    # z = wdef_flat @ x is one MXU call and z[k*O_pad : k*O_pad+O] == w_def[:, :, k].
    wdef_t = jnp.transpose(w_def, (2, 0, 1))
    if O_pad != O:
        wdef_t = jnp.pad(wdef_t, ((0, 0), (0, O_pad - O), (0, 0)))
    wdef2 = wdef_t.reshape(K * O_pad, C).astype(mx_dtype)

    # ---- scoped VMEM: size from actual buffers + headroom (do not request 64 MiB) ----
    xb = 2 if use_bf16 else 4
    zb = 2 if use_bf16 else 4
    need = (2 * C * L * xb                # x block (double-buffered)
            + K * O_pad * L * zb          # z scratch
            + max(GK, 8) * L * 4          # offset scratch (sublane-padded)
            + 2 * O * TL * 4              # out block (double-buffered)
            + 5 * C * L * 4               # per-batch stage temporaries
            + 8 * W_TOT * TL * 4)         # per-tile hat/D temporaries
    if vmem_limit_bytes is None:
        vmem_limit_bytes = int(min(max(need * 3 // 2 + (2 << 20), 16 << 20), 48 << 20))

    kernel = functools.partial(
        _dcn1d_kernel, C=C, O=O, O_pad=O_pad, L=L, K=K, TL=TL, W_TOT=W_TOT,
        stride=stride, padding=padding, dilation=dilation, pad_dw=pad_dw,
        eps=1e-5, off_clamp=off_clamp, m_dtype=m_dtype)

    return pl.pallas_call(
        kernel,
        out_shape=jax.ShapeDtypeStruct((B, O, L), jnp.float32),
        grid=(B, T),
        in_specs=[
            pl.BlockSpec((None, C, L), lambda b, t: (b, 0, 0)),   # x, per-batch
            pl.BlockSpec((C, K), lambda b, t: (0, 0)),            # depthwise weight
            pl.BlockSpec((C, 1), lambda b, t: (0, 0)),            # depthwise bias
            pl.BlockSpec((C, 1), lambda b, t: (0, 0)),            # LN gamma
            pl.BlockSpec((C, 1), lambda b, t: (0, 0)),            # LN beta
            pl.BlockSpec((GK, C), lambda b, t: (0, 0)),           # offset weight (GK, C)
            pl.BlockSpec((GK, 1), lambda b, t: (0, 0)),           # offset bias
            pl.BlockSpec((K * O_pad, C), lambda b, t: (0, 0)),    # deform weight, flattened
        ],
        out_specs=pl.BlockSpec((None, O, TL), lambda b, t: (b, 0, t)),
        scratch_shapes=[
            pltpu.VMEM((GK, L), jnp.float32),                     # offsets, (GK, L)
            pltpu.VMEM((K * O_pad, L), mx_dtype),                 # z = wdef_flat @ x
        ],
        compiler_params=pltpu.CompilerParams(
            # B is embarrassingly parallel (megacore); the L-tile axis carries the
            # per-batch z/offset scratch (initialized at tile 0), so it stays arbitrary.
            dimension_semantics=("parallel", "arbitrary"),
            vmem_limit_bytes=vmem_limit_bytes,
        ),
    )(x.astype(mx_dtype), wdw2, bdw2, lng2, lnb2, woff2, boff2, wdef2)


def reference(x, params, *, kernel_size=3, stride=1, padding=1, dilation=1):
    """Pure-JAX reference with the module's semantics (independent of the kernel's
    hat-function / reordered-contraction formulation)."""
    w_dw, b_dw, ln_g, ln_b, w_off, b_off, w_def = params
    B, C, L = x.shape
    O = w_def.shape[0]
    K = kernel_size
    pad_dw = (K - 1) // 2
    hp = jax.lax.Precision.HIGHEST
    xpad = jnp.pad(x, ((0, 0), (0, 0), (pad_dw, pad_dw)))
    out = b_dw[None, :, None] + sum(
        w_dw[None, :, 0, k, None] * xpad[:, :, k:k + L] for k in range(K))
    h = jnp.transpose(out, (0, 2, 1))                            # (B, L, C)
    mu = h.mean(-1, keepdims=True)
    var = ((h - mu) ** 2).mean(-1, keepdims=True)
    hn = (h - mu) * jax.lax.rsqrt(var + 1e-5) * ln_g + ln_b
    hn = jnp.maximum(hn, 0.0)
    off = jnp.einsum('blc,kc->blk', hn, w_off, precision=hp) + b_off   # (B, L, GK)
    p = jnp.arange(L, dtype=jnp.float32)[None, :, None]
    l_ids = jnp.arange(L, dtype=jnp.float32)[None, None, :]
    y = jnp.zeros((B, O, L), jnp.float32)
    for k in range(K):
        s = p * stride - padding + k * dilation + off[:, :, k:k + 1]   # (B, Lo, 1)
        s0 = jnp.floor(s)
        frac = s - s0
        d = l_ids - s0                                                 # (B, Lo, Li)
        m = (jnp.where(d == 0.0, 1.0 - frac, 0.0)
             + jnp.where(d == 1.0, frac, 0.0))
        samp = jnp.einsum('bcl,bpl->bcp', x, m, precision=hp)
        y = y + jnp.einsum('oc,bcp->bop', w_def[:, :, k], samp, precision=hp)
    return y


if __name__ == "__main__":
    B, C, O, L, K = 2, 8, 8, 512, 3
    GROUPS = 1
    key = jax.random.PRNGKey(0)
    ks = jax.random.split(key, 8)

    x = jax.random.normal(ks[0], (B, C, L), jnp.float32)
    w_dw = jax.random.normal(ks[1], (C, 1, K), jnp.float32) * 0.3    # depthwise conv
    b_dw = jax.random.normal(ks[2], (C,), jnp.float32) * 0.1
    ln_g = 1.0 + 0.1 * jax.random.normal(ks[3], (C,), jnp.float32)   # LayerNorm
    ln_b = 0.1 * jax.random.normal(ks[4], (C,), jnp.float32)
    w_off = jax.random.normal(ks[5], (GROUPS * K, C), jnp.float32) * 0.2   # offset Linear
    b_off = jax.random.normal(ks[6], (GROUPS * K,), jnp.float32) * 0.1
    w_def = jax.random.normal(ks[7], (O, C, K), jnp.float32) * 0.3   # deform conv (bias=False)

    params = (w_dw, b_dw, ln_g, ln_b, w_off, b_off, w_def)
    y_ref = reference(x, params, kernel_size=K)

    # Tolerance note: the kernel re-associates the deform contraction ((wdef@x)@m vs
    # wdef@(x@m)) and TPU f32 matmuls may run multi-pass bf16, so errors no longer
    # cancel exactly against the XLA reference; semantic bugs would be O(0.3+).
    TOL32 = dict(atol=5e-2, rtol=5e-2)

    # 1) f32 operands, banded window (default band_halo=128; offsets here are small so
    #    the clamp never fires and the band is exact) -- semantics check.
    y = jax.block_until_ready(deformable_conv1d(x, params, kernel_size=K,
                                                use_bf16=False))
    assert y.shape == (B, O, L), y.shape
    assert jnp.allclose(y, y_ref, **TOL32), float(jnp.max(jnp.abs(y - y_ref)))

    # 2) f32 operands, full interpolation window (banding disabled) -- exact path.
    y_full = jax.block_until_ready(deformable_conv1d(x, params, kernel_size=K,
                                                     use_bf16=False, band_halo=0))
    assert jnp.allclose(y_full, y_ref, **TOL32), float(jnp.max(jnp.abs(y_full - y_ref)))

    # 3) default fast path: bf16 x / z / m, banded window (relaxed tolerance).
    y_bf16 = jax.block_until_ready(deformable_conv1d(x, params, kernel_size=K))
    assert jnp.allclose(y_bf16, y_ref, atol=3e-1, rtol=3e-1), (
        float(jnp.max(jnp.abs(y_bf16 - y_ref))))

    print("KERNEL_OK")
</pallas_src>

<mosaic_0001>
module attributes {stable_mosaic.version = 11 : i64} {
  func.func @_dcn1d_kernel(%arg0: i32, %arg1: i32, %arg2: memref<1x8x512xf32, #tpu.memory_space<vmem>>, %arg3: memref<8x3xf32, #tpu.memory_space<vmem>>, %arg4: memref<8x1xf32, #tpu.memory_space<vmem>>, %arg5: memref<8x1xf32, #tpu.memory_space<vmem>>, %arg6: memref<8x1xf32, #tpu.memory_space<vmem>>, %arg7: memref<3x8xf32, #tpu.memory_space<vmem>>, %arg8: memref<3x1xf32, #tpu.memory_space<vmem>>, %arg9: memref<24x8xf32, #tpu.memory_space<vmem>>, %arg10: memref<1x8x128xf32, #tpu.memory_space<vmem>>, %arg11: memref<3x512xf32, #tpu.memory_space<vmem>>, %arg12: memref<24x512xf32, #tpu.memory_space<vmem>>) attributes {dimension_semantics = [#tpu.dimension_semantics<parallel>, #tpu.dimension_semantics<arbitrary>], iteration_bounds = array<i64: 2, 4>, scalar_prefetch = 0 : i64, scratch_operands = 2 : i64, tpu.core_type = #tpu.core_type<tc>, window_params = [{transform_indices = @transform_0, window_bounds = array<i64: 1, 8, 512>}, {pipeline_mode = #tpu.pipeline_mode<synchronous>, transform_indices = @transform_1, window_bounds = array<i64: 8, 3>}, {pipeline_mode = #tpu.pipeline_mode<synchronous>, transform_indices = @transform_2, window_bounds = array<i64: 8, 1>}, {pipeline_mode = #tpu.pipeline_mode<synchronous>, transform_indices = @transform_3, window_bounds = array<i64: 8, 1>}, {pipeline_mode = #tpu.pipeline_mode<synchronous>, transform_indices = @transform_4, window_bounds = array<i64: 8, 1>}, {pipeline_mode = #tpu.pipeline_mode<synchronous>, transform_indices = @transform_5, window_bounds = array<i64: 3, 8>}, {pipeline_mode = #tpu.pipeline_mode<synchronous>, transform_indices = @transform_6, window_bounds = array<i64: 3, 1>}, {pipeline_mode = #tpu.pipeline_mode<synchronous>, transform_indices = @transform_7, window_bounds = array<i64: 24, 8>}, {transform_indices = @transform_8, window_bounds = array<i64: 1, 8, 128>}]} {
    %c0_i32 = arith.constant 0 : i32
    %0 = arith.cmpi eq, %arg1, %c0_i32 : i32
    %1 = arith.extui %0 : i1 to i32
    %c0_i32_0 = arith.constant 0 : i32
    %2 = arith.cmpi ne, %1, %c0_i32_0 : i32
    scf.if %2 {
      %c0_20 = arith.constant 0 : index
      %c0_21 = arith.constant 0 : index
      %c0_22 = arith.constant 0 : index
      %76 = vector.load %arg2[%c0_20, %c0_21, %c0_22] : memref<1x8x512xf32, #tpu.memory_space<vmem>>, vector<1x8x512xf32>
      %77 = vector.shape_cast %76 : vector<1x8x512xf32> to vector<8x512xf32>
      %c0_23 = arith.constant 0 : index
      %c0_24 = arith.constant 0 : index
      %78 = vector.load %arg3[%c0_23, %c0_24] : memref<8x3xf32, #tpu.memory_space<vmem>>, vector<8x3xf32>
      %79 = tpu.iota {dimensions = array<i32: 1>} : vector<1x512xi32>
      %cst_25 = arith.constant 0.000000e+00 : f32
      %80 = vector.broadcast %cst_25 : f32 to vector<8x512xf32>
      %c1_i32_26 = arith.constant 1 : i32
      %81 = tpu.dynamic_rotate %77 by %c1_i32_26 dim 1 : vector<8x512xf32>, i32 -> vector<8x512xf32>
      %c1_i32_27 = arith.constant 1 : i32
      %82 = vector.broadcast %c1_i32_27 : i32 to vector<1x512xi32>
      %83 = arith.cmpi sge, %79, %82 : vector<1x512xi32>
      %cst_28 = arith.constant 0.000000e+00 : f32
      %84 = vector.shape_cast %83 : vector<1x512xi1> to vector<1x512xi1>
      %85 = vector.broadcast %84 : vector<1x512xi1> to vector<8x512xi1>
      %86 = vector.broadcast %cst_28 : f32 to vector<8x512xf32>
      %87 = arith.select %85, %81, %86 : vector<8x512xi1>, vector<8x512xf32>
      %88 = vector.extract_strided_slice %78 {offsets = [0, 0], sizes = [8, 1], strides = [1, 1]} : vector<8x3xf32> to vector<8x1xf32>
      %89 = vector.broadcast %88 : vector<8x1xf32> to vector<8x512xf32>
      %90 = arith.mulf %89, %87 : vector<8x512xf32>
      %91 = arith.addf %80, %90 : vector<8x512xf32>
      %92 = vector.extract_strided_slice %78 {offsets = [0, 1], sizes = [8, 1], strides = [1, 1]} : vector<8x3xf32> to vector<8x1xf32>
      %93 = vector.broadcast %92 : vector<8x1xf32> to vector<8x512xf32>
      %94 = arith.mulf %93, %77 : vector<8x512xf32>
      %95 = arith.addf %91, %94 : vector<8x512xf32>
      %c511_i32 = arith.constant 511 : i32
      %96 = tpu.dynamic_rotate %77 by %c511_i32 dim 1 : vector<8x512xf32>, i32 -> vector<8x512xf32>
      %c511_i32_29 = arith.constant 511 : i32
      %97 = vector.broadcast %c511_i32_29 : i32 to vector<1x512xi32>
      %98 = arith.cmpi slt, %79, %97 : vector<1x512xi32>
      %cst_30 = arith.constant 0.000000e+00 : f32
      %99 = vector.shape_cast %98 : vector<1x512xi1> to vector<1x512xi1>
      %100 = vector.broadcast %99 : vector<1x512xi1> to vector<8x512xi1>
      %101 = vector.broadcast %cst_30 : f32 to vector<8x512xf32>
      %102 = arith.select %100, %96, %101 : vector<8x512xi1>, vector<8x512xf32>
      %103 = vector.extract_strided_slice %78 {offsets = [0, 2], sizes = [8, 1], strides = [1, 1]} : vector<8x3xf32> to vector<8x1xf32>
      %104 = vector.broadcast %103 : vector<8x1xf32> to vector<8x512xf32>
      %105 = arith.mulf %104, %102 : vector<8x512xf32>
      %106 = arith.addf %95, %105 : vector<8x512xf32>
      %c0_31 = arith.constant 0 : index
      %c0_32 = arith.constant 0 : index
      %107 = vector.load %arg4[%c0_31, %c0_32] : memref<8x1xf32, #tpu.memory_space<vmem>>, vector<8x1xf32>
      %108 = vector.broadcast %107 : vector<8x1xf32> to vector<8x512xf32>
      %109 = arith.addf %106, %108 : vector<8x512xf32>
      %cst_33 = arith.constant dense<0.000000e+00> : vector<512xf32>
      %110 = vector.multi_reduction <add>, %109, %cst_33 [0] : vector<8x512xf32> to vector<512xf32>
      %111 = vector.shape_cast %110 : vector<512xf32> to vector<1x512xf32>
      %cst_34 = arith.constant 8.000000e+00 : f32
      %112 = vector.broadcast %cst_34 : f32 to vector<1x512xf32>
      %113 = arith.divf %111, %112 : vector<1x512xf32>
      %114 = vector.broadcast %113 : vector<1x512xf32> to vector<8x512xf32>
      %115 = arith.subf %109, %114 : vector<8x512xf32>
      %116 = vector.broadcast %113 : vector<1x512xf32> to vector<8x512xf32>
      %117 = arith.subf %109, %116 : vector<8x512xf32>
      %118 = arith.mulf %115, %117 : vector<8x512xf32>
      %cst_35 = arith.constant dense<0.000000e+00> : vector<512xf32>
      %119 = vector.multi_reduction <add>, %118, %cst_35 [0] : vector<8x512xf32> to vector<512xf32>
      %120 = vector.shape_cast %119 : vector<512xf32> to vector<1x512xf32>
      %cst_36 = arith.constant 8.000000e+00 : f32
      %121 = vector.broadcast %cst_36 : f32 to vector<1x512xf32>
      %122 = arith.divf %120, %121 : vector<1x512xf32>
      %123 = vector.broadcast %113 : vector<1x512xf32> to vector<8x512xf32>
      %124 = arith.subf %109, %123 : vector<8x512xf32>
      %cst_37 = arith.constant 9.99999974E-6 : f32
      %125 = vector.broadcast %cst_37 : f32 to vector<1x512xf32>
      %126 = arith.addf %122, %125 : vector<1x512xf32>
      %127 = math.rsqrt %126 : vector<1x512xf32>
      %128 = vector.broadcast %127 : vector<1x512xf32> to vector<8x512xf32>
      %129 = arith.mulf %124, %128 : vector<8x512xf32>
      %c0_38 = arith.constant 0 : index
      %c0_39 = arith.constant 0 : index
      %130 = vector.load %arg5[%c0_38, %c0_39] : memref<8x1xf32, #tpu.memory_space<vmem>>, vector<8x1xf32>
      %131 = vector.broadcast %130 : vector<8x1xf32> to vector<8x512xf32>
      %132 = arith.mulf %129, %131 : vector<8x512xf32>
      %c0_40 = arith.constant 0 : index
      %c0_41 = arith.constant 0 : index
      %133 = vector.load %arg6[%c0_40, %c0_41] : memref<8x1xf32, #tpu.memory_space<vmem>>, vector<8x1xf32>
      %134 = vector.broadcast %133 : vector<8x1xf32> to vector<8x512xf32>
      %135 = arith.addf %132, %134 : vector<8x512xf32>
      %cst_42 = arith.constant 0.000000e+00 : f32
      %136 = vector.broadcast %cst_42 : f32 to vector<8x512xf32>
      %137 = arith.maximumf %135, %136 : vector<8x512xf32>
      %c0_43 = arith.constant 0 : index
      %c0_44 = arith.constant 0 : index
      %138 = vector.load %arg7[%c0_43, %c0_44] : memref<3x8xf32, #tpu.memory_space<vmem>>, vector<3x8xf32>
      %cst_45 = arith.constant dense<0.000000e+00> : vector<3x512xf32>
      %139 = tpu.matmul %138, %137, %cst_45 {dimension_numbers = #tpu.dot_dimension_numbers<[1], [0], [0], [1], [0, 0, 1, 1], [], []>} : vector<3x8xf32>, vector<8x512xf32>, vector<3x512xf32> -> vector<3x512xf32>
      %c0_46 = arith.constant 0 : index
      %c0_47 = arith.constant 0 : index
      %140 = vector.load %arg8[%c0_46, %c0_47] : memref<3x1xf32, #tpu.memory_space<vmem>>, vector<3x1xf32>
      %141 = vector.broadcast %140 : vector<3x1xf32> to vector<3x512xf32>
      %142 = arith.addf %139, %141 : vector<3x512xf32>
      %cst_48 = arith.constant -1.240000e+02 : f32
      %cst_49 = arith.constant 1.240000e+02 : f32
      %143 = vector.broadcast %cst_48 : f32 to vector<3x512xf32>
      %144 = arith.maximumf %143, %142 : vector<3x512xf32>
      %145 = vector.broadcast %cst_49 : f32 to vector<3x512xf32>
      %146 = arith.minimumf %145, %144 : vector<3x512xf32>
      %c0_50 = arith.constant 0 : index
      %c0_51 = arith.constant 0 : index
      %147 = vector.load %arg11[%c0_50, %c0_51] : memref<3x512xf32, #tpu.memory_space<vmem>>, vector<3x512xf32>
      tpu.vector_store %arg11[%c0_50, %c0_51], %146 {strides = array<i32>} : memref<3x512xf32, #tpu.memory_space<vmem>>, vector<3x512xf32>,
      %c0_52 = arith.constant 0 : index
      %c0_53 = arith.constant 0 : index
      %148 = vector.load %arg9[%c0_52, %c0_53] : memref<24x8xf32, #tpu.memory_space<vmem>>, vector<24x8xf32>
      %c0_54 = arith.constant 0 : index
      %c0_55 = arith.constant 0 : index
      %c0_56 = arith.constant 0 : index
      %149 = vector.load %arg2[%c0_54, %c0_55, %c0_56] : memref<1x8x512xf32, #tpu.memory_space<vmem>>, vector<1x8x512xf32>
      %150 = vector.shape_cast %149 : vector<1x8x512xf32> to vector<8x512xf32>
      %cst_57 = arith.constant dense<0.000000e+00> : vector<24x512xf32>
      %151 = tpu.matmul %148, %150, %cst_57 {dimension_numbers = #tpu.dot_dimension_numbers<[1], [0], [0], [1], [0, 0, 1, 1], [], []>} : vector<24x8xf32>, vector<8x512xf32>, vector<24x512xf32> -> vector<24x512xf32>
      %c0_58 = arith.constant 0 : index
      %c0_59 = arith.constant 0 : index
      %152 = vector.load %arg12[%c0_58, %c0_59] : memref<24x512xf32, #tpu.memory_space<vmem>>, vector<24x512xf32>
      tpu.vector_store %arg12[%c0_58, %c0_59], %151 {strides = array<i32>} : memref<24x512xf32, #tpu.memory_space<vmem>>, vector<24x512xf32>,
    } else {
    }
    %c128_i32 = arith.constant 128 : i32
    %3 = arith.muli %arg1, %c128_i32 : i32
    %4 = tpu.assume_multiple %3, 128 : i32
    %c128_i32_1 = arith.constant 128 : i32
    %5 = arith.subi %4, %c128_i32_1 : i32
    %c0_i32_2 = arith.constant 0 : i32
    %c128_i32_3 = arith.constant 128 : i32
    %6 = arith.maxsi %c0_i32_2, %5 : i32
    %7 = arith.minsi %c128_i32_3, %6 : i32
    %8 = tpu.assume_multiple %7, 128 : i32
    %9 = tpu.iota {dimensions = array<i32: 0>} : vector<384x1xi32>
    %10 = arith.sitofp %9 : vector<384x1xi32> to vector<384x1xf32>
    %11 = tpu.iota {dimensions = array<i32: 1>} : vector<1x128xi32>
    %12 = arith.sitofp %11 : vector<1x128xi32> to vector<1x128xf32>
    %c1_i32 = arith.constant 1 : i32
    %13 = arith.muli %4, %c1_i32 : i32
    %c1_i32_4 = arith.constant 1 : i32
    %14 = arith.subi %13, %c1_i32_4 : i32
    %15 = arith.subi %14, %8 : i32
    %c0 = arith.constant 0 : index
    %16 = arith.index_cast %4 : i32 to index
    %17 = vector.load %arg11[%c0, %16] : memref<3x512xf32, #tpu.memory_space<vmem>>, vector<3x128xf32>
    %cst = arith.constant 0.000000e+00 : f32
    %18 = vector.broadcast %cst : f32 to vector<8x128xf32>
    %c0_i32_5 = arith.constant 0 : i32
    %19 = arith.addi %15, %c0_i32_5 : i32
    %20 = arith.sitofp %19 : i32 to f32
    %21 = vector.extract_strided_slice %17 {offsets = [0, 0], sizes = [1, 128], strides = [1, 1]} : vector<3x128xf32> to vector<1x128xf32>
    %22 = vector.broadcast %20 : f32 to vector<1x128xf32>
    %23 = arith.addf %12, %22 : vector<1x128xf32>
    %24 = arith.addf %21, %23 : vector<1x128xf32>
    %25 = vector.broadcast %10 : vector<384x1xf32> to vector<384x128xf32>
    %26 = vector.broadcast %24 : vector<1x128xf32> to vector<384x128xf32>
    %27 = arith.subf %25, %26 : vector<384x128xf32>
    %28 = math.absf %27 : vector<384x128xf32>
    %cst_6 = arith.constant 1.000000e+00 : f32
    %29 = vector.broadcast %cst_6 : f32 to vector<384x128xf32>
    %30 = arith.subf %29, %28 : vector<384x128xf32>
    %cst_7 = arith.constant 0.000000e+00 : f32
    %31 = vector.broadcast %cst_7 : f32 to vector<384x128xf32>
    %32 = arith.maximumf %30, %31 : vector<384x128xf32>
    %c0_8 = arith.constant 0 : index
    %33 = arith.index_cast %8 : i32 to index
    %34 = vector.load %arg12[%c0_8, %33] : memref<24x512xf32, #tpu.memory_space<vmem>>, vector<8x384xf32>
    %cst_9 = arith.constant dense<0.000000e+00> : vector<8x128xf32>
    %35 = tpu.matmul %34, %32, %cst_9 {dimension_numbers = #tpu.dot_dimension_numbers<[1], [0], [0], [1], [0, 0, 1, 1], [], []>} : vector<8x384xf32>, vector<384x128xf32>, vector<8x128xf32> -> vector<8x128xf32>
    %36 = arith.addf %18, %35 : vector<8x128xf32>
    %c1_i32_10 = arith.constant 1 : i32
    %37 = arith.addi %15, %c1_i32_10 : i32
    %38 = arith.sitofp %37 : i32 to f32
    %39 = vector.extract_strided_slice %17 {offsets = [1, 0], sizes = [1, 128], strides = [1, 1]} : vector<3x128xf32> to vector<1x128xf32>
    %40 = vector.broadcast %38 : f32 to vector<1x128xf32>
    %41 = arith.addf %12, %40 : vector<1x128xf32>
    %42 = arith.addf %39, %41 : vector<1x128xf32>
    %43 = vector.broadcast %10 : vector<384x1xf32> to vector<384x128xf32>
    %44 = vector.broadcast %42 : vector<1x128xf32> to vector<384x128xf32>
    %45 = arith.subf %43, %44 : vector<384x128xf32>
    %46 = math.absf %45 : vector<384x128xf32>
    %cst_11 = arith.constant 1.000000e+00 : f32
    %47 = vector.broadcast %cst_11 : f32 to vector<384x128xf32>
    %48 = arith.subf %47, %46 : vector<384x128xf32>
    %cst_12 = arith.constant 0.000000e+00 : f32
    %49 = vector.broadcast %cst_12 : f32 to vector<384x128xf32>
    %50 = arith.maximumf %48, %49 : vector<384x128xf32>
    %c8 = arith.constant 8 : index
    %51 = arith.index_cast %8 : i32 to index
    %52 = vector.load %arg12[%c8, %51] : memref<24x512xf32, #tpu.memory_space<vmem>>, vector<8x384xf32>
    %cst_13 = arith.constant dense<0.000000e+00> : vector<8x128xf32>
    %53 = tpu.matmul %52, %50, %cst_13 {dimension_numbers = #tpu.dot_dimension_numbers<[1], [0], [0], [1], [0, 0, 1, 1], [], []>} : vector<8x384xf32>, vector<384x128xf32>, vector<8x128xf32> -> vector<8x128xf32>
    %54 = arith.addf %36, %53 : vector<8x128xf32>
    %c2_i32 = arith.constant 2 : i32
    %55 = arith.addi %15, %c2_i32 : i32
    %56 = arith.sitofp %55 : i32 to f32
    %57 = vector.extract_strided_slice %17 {offsets = [2, 0], sizes = [1, 128], strides = [1, 1]} : vector<3x128xf32> to vector<1x128xf32>
    %58 = vector.broadcast %56 : f32 to vector<1x128xf32>
    %59 = arith.addf %12, %58 : vector<1x128xf32>
    %60 = arith.addf %57, %59 : vector<1x128xf32>
    %61 = vector.broadcast %10 : vector<384x1xf32> to vector<384x128xf32>
    %62 = vector.broadcast %60 : vector<1x128xf32> to vector<384x128xf32>
    %63 = arith.subf %61, %62 : vector<384x128xf32>
    %64 = math.absf %63 : vector<384x128xf32>
    %cst_14 = arith.constant 1.000000e+00 : f32
    %65 = vector.broadcast %cst_14 : f32 to vector<384x128xf32>
    %66 = arith.subf %65, %64 : vector<384x128xf32>
    %cst_15 = arith.constant 0.000000e+00 : f32
    %67 = vector.broadcast %cst_15 : f32 to vector<384x128xf32>
    %68 = arith.maximumf %66, %67 : vector<384x128xf32>
    %c16 = arith.constant 16 : index
    %69 = arith.index_cast %8 : i32 to index
    %70 = vector.load %arg12[%c16, %69] : memref<24x512xf32, #tpu.memory_space<vmem>>, vector<8x384xf32>
    %cst_16 = arith.constant dense<0.000000e+00> : vector<8x128xf32>
    %71 = tpu.matmul %70, %68, %cst_16 {dimension_numbers = #tpu.dot_dimension_numbers<[1], [0], [0], [1], [0, 0, 1, 1], [], []>} : vector<8x384xf32>, vector<384x128xf32>, vector<8x128xf32> -> vector<8x128xf32>
    %72 = arith.addf %54, %71 : vector<8x128xf32>
    %c0_17 = arith.constant 0 : index
    %c0_18 = arith.constant 0 : index
    %c0_19 = arith.constant 0 : index
    %73 = vector.load %arg10[%c0_17, %c0_18, %c0_19] : memref<1x8x128xf32, #tpu.memory_space<vmem>>, vector<1x8x128xf32>
    %74 = vector.shape_cast %73 : vector<1x8x128xf32> to vector<8x128xf32>
    %75 = vector.shape_cast %72 : vector<8x128xf32> to vector<1x8x128xf32>
    tpu.vector_store %arg10[%c0_17, %c0_18, %c0_19], %75 {strides = array<i32>} : memref<1x8x128xf32, #tpu.memory_space<vmem>>, vector<1x8x128xf32>,
    return
  }
  func.func @transform_0(%arg0: i32, %arg1: i32) -> (i32, i32, i32) {
    %c0_i32 = arith.constant 0 : i32
    %c0_i32_0 = arith.constant 0 : i32
    %c0_i32_1 = arith.constant 0 : i32
    return %arg0, %c0_i32, %c0_i32_0 : i32, i32, i32
  }
  func.func @transform_1(%arg0: i32, %arg1: i32) -> (i32, i32) {
    %c0_i32 = arith.constant 0 : i32
    %c0_i32_0 = arith.constant 0 : i32
    %c0_i32_1 = arith.constant 0 : i32
    return %c0_i32, %c0_i32_0 : i32, i32
  }
  func.func @transform_2(%arg0: i32, %arg1: i32) -> (i32, i32) {
    %c0_i32 = arith.constant 0 : i32
    %c0_i32_0 = arith.constant 0 : i32
    %c0_i32_1 = arith.constant 0 : i32
    return %c0_i32, %c0_i32_0 : i32, i32
  }
  func.func @transform_3(%arg0: i32, %arg1: i32) -> (i32, i32) {
    %c0_i32 = arith.constant 0 : i32
    %c0_i32_0 = arith.constant 0 : i32
    %c0_i32_1 = arith.constant 0 : i32
    return %c0_i32, %c0_i32_0 : i32, i32
  }
  func.func @transform_4(%arg0: i32, %arg1: i32) -> (i32, i32) {
    %c0_i32 = arith.constant 0 : i32
    %c0_i32_0 = arith.constant 0 : i32
    %c0_i32_1 = arith.constant 0 : i32
    return %c0_i32, %c0_i32_0 : i32, i32
  }
  func.func @transform_5(%arg0: i32, %arg1: i32) -> (i32, i32) {
    %c0_i32 = arith.constant 0 : i32
    %c0_i32_0 = arith.constant 0 : i32
    %c0_i32_1 = arith.constant 0 : i32
    return %c0_i32, %c0_i32_0 : i32, i32
  }
  func.func @transform_6(%arg0: i32, %arg1: i32) -> (i32, i32) {
    %c0_i32 = arith.constant 0 : i32
    %c0_i32_0 = arith.constant 0 : i32
    %c0_i32_1 = arith.constant 0 : i32
    return %c0_i32, %c0_i32_0 : i32, i32
  }
  func.func @transform_7(%arg0: i32, %arg1: i32) -> (i32, i32) {
    %c0_i32 = arith.constant 0 : i32
    %c0_i32_0 = arith.constant 0 : i32
    %c0_i32_1 = arith.constant 0 : i32
    return %c0_i32, %c0_i32_0 : i32, i32
  }
  func.func @transform_8(%arg0: i32, %arg1: i32) -> (i32, i32, i32) {
    %c0_i32 = arith.constant 0 : i32
    %c0_i32_0 = arith.constant 0 : i32
    return %arg0, %c0_i32, %arg1 : i32, i32, i32
  }
}

</mosaic_0001>

<bundles_post_ra>
// kernel: tpu_custom_call.1
= control target key start
LH: loop header
LB: loop body
LE: loop exit
PB: predicated region body
PF: predicated region fallthrough
CT: control target
= control target key end

     0   :  { %s3451_s0 = inlined_call_operand.vmem [shape: f32[2,8,512], index: 0, kind: input, shape index: {}]   ;;  %s3452_s1 = inlined_call_operand.vmem [shape: f32[8,3], index: 1, kind: input, shape index: {}]   ;;  %s3453_s2 = inlined_call_operand.vmem [shape: f32[8,1], index: 2, kind: input, shape index: {}]   ;;  %s3454_s3 = inlined_call_operand.vmem [shape: f32[8,1], index: 3, kind: input, shape index: {}]   ;;  %s3455_s4 = inlined_call_operand.vmem [shape: f32[8,1], index: 4, kind: input, shape index: {}]   ;;  %s3456_s5 = inlined_call_operand.vmem [shape: f32[3,8], index: 5, kind: input, shape index: {}]   ;;  %s3457_s6 = inlined_call_operand.vmem [shape: f32[3,1], index: 6, kind: input, shape index: {}]   ;;  %s3458_s7 = inlined_call_operand.vmem [shape: f32[24,8], index: 7, kind: input, shape index: {}]   ;;  %s3459_s8 = inlined_call_operand.hbm [shape: f32[2,8,512], index: 8, kind: output, shape index: {}]  }
   0x1   :  { %3488 = sst [smem:[#allocation24_spill]] %s3451_s0 }
   0x2   :  { %13 = vsyncpa [#allocation5], 0 }
   0x3   :  { %15 = vsyncpa [#allocation5 + $0x1], 0  ;;  %s2685_s27 = smov 0   ;;  %s2687_s28 = smov 0  }
   0x4   :  { %s2689_s29 = smov 0   ;;  %s2691_s30 = smov 0  }
   0x5   :  { %s2693_s9 = smov 0   ;;  %s2695_s10 = smov 0  }
   0x6   :  { %s2697_s11 = smov 0   ;;  %s2699_s12 = smov 0  }
   0x7 LB: > { %s2145_s13 = sadd.s32 4294967295, %s2629_s12   ;;  %s2146_s14 = sadd.s32 4294967294, %s2629_s12   ;;  %s2629_s12 = sphi %s2699_s12, %s21_s12   ;;  %s2625_s11 = sphi %s2697_s11, %s3541_s11   ;;  %s2621_s10 = sphi %s2695_s10, %s3540_s10   ;;  %s2617_s9 = sphi %s2693_s9, %s3539_s9   ;;  %s2613_s30 = sphi %s2691_s30, %s3538_s30   ;;  %s2609_s29 = sphi %s2689_s29, %s3537_s29   ;;  %s2605_s28 = sphi %s2687_s28, %s3536_s28   ;;  %s2601_s27 = sphi %s2685_s27, %s3535_s27  }
   0x8   : > { %s30_s15 = sadd.s32 1, %s2621_s10  ;;  %s33_s16 = sadd.s32 1, %s2625_s11 }
   0x9   : > { %p31_p0 = scmp.ge.s32.totalorder %s30_s15, 4  ;;  %p225_p1 = scmp.ne.s32.totalorder %s2609_s29, %s2605_s28 }
   0xa   : > { %p226_p2 = scmp.eq.s32.totalorder %s2145_s13, 7  ;;  %p231_p5 = scmp.ne.s32.totalorder %s2605_s28, %s2601_s27 }
   0xb   : > { %s3543_s15 = smov (%p31_p0, %s30_s15), 0  ;;  %s3545_s16 = smov (!%p31_p0, %s33_s16), %s2625_s11 }
   0xc   : > { %s211_s17 = ssub.s32 %s2621_s10, %s3543_s15  ;;  %p2736_p3 = por %p226_p2, %p225_p1 }
   0xd   : > { %p35_p4 = scmp.ge.s32.totalorder %s3545_s16, 2  ;;  %p232_p6 = scmp.eq.s32.totalorder %s2146_s14, 7 }
   0xe   : > { %p2149_p7 = scmp.ge.s32.totalorder %s2629_s12, 1  ;;  %p279_p9 = scmp.lt.s32.totalorder %s2629_s12, 9 }
   0xf   : > { %s3547_s16 = smov (%p35_p4, %s3545_s16), 0  ;;  %p2745_p8 = por %p232_p6, %p231_p5 }
  0x10   : > { %3490 = sst [smem:[#allocation7_spill]] %s3547_s16  ;;  %s210_s20 = ssub.s32 %s2625_s11, %s3547_s16 }
  0x11   : > { %s215_s21 = sadd.s32 1, %s2609_s29  ;;  %s212_s22 = sor.u32 %s211_s17, %s210_s20 }
  0x12   : > { %p280_p10 = pnand %p2149_p7, %p279_p9  ;;  %p213_p11 = scmp.eq.s32.totalorder %s212_s22, 0 }
  0x14   : > { %s2754_s23 = scalar_select %p213_p11, %s2609_s29, %s215_s21  }
  0x15   : > { %283 = sbr.rel (%p280_p10) target bundleno = 852 (0x354), region = 52 }
  0x1a   : > { %s3461_s24 = sand.u32 1, %s2605_s28   ;;  %p313_p12 = scmp.lt.s32.totalorder %s2617_s9, 1 }
  0x1b   : > { %s2760_s25 = sshll.u32 %s3461_s24, 3  ;;  %s3492_s0 = sld [smem:[#allocation24_spill]] }
  0x1c   : > { %s314_s26 = scalar_select %p313_p12, %s2617_s9, 1 }
  0x1d   : > { %p2153_p13 = scmp.ne.s32.totalorder %s2613_s30, 0 }
  0x1e   : > { %s2181_s13 = sshll.u32 %s314_s26, 5  ;;  %s2634_s16 = smov (!%p2153_p13), 1  }
  0x1f   : > { %321 = sbr.rel (%p2153_p13) target bundleno = 455 (0x1c7), region = 56  ;;  %s2635_s26 = smov (!%p2153_p13), 127  }
  0x21   : > { %s317_s17 = scalar_lea.vmem %s3492_s0, %s2181_s13 }
  0x24   : > { %v326_v0 = vld [vmem:[%s3452_s1] sm:$0xff]  ;;  %v2631_v1 = vmov 2   ;;  %v2632_v2 = vmov 1   ;;  %v2633_v4 = vmov 0   ;;  %v2774_v5 = vld [vmem:[%s317_s17 + $0x8] sm:$0xff]  ;;  %v2776_v6 = vld [vmem:[%s317_s17 + $0x10] sm:$0xff]  ;;  %v327_v16 = vlaneseq }
  0x25   : > { %2526 = vset.pattern.permute.xlu1 %v2631_v1  ;;  %2524 = vset.pattern.permute.xlu0 %v2632_v2  ;;  %v2771_v3 = vld [vmem:[%s317_s17] sm:$0xff]  ;;  %v2780_v7 = vld [vmem:[%s317_s17 + $0x18] sm:$0xff]  ;;  %v2636_v12 = vmov 0.0   ;;  %vm545_vm4 = vcmask 64512  }
  0x26   : > { %416 = vperm.xlu1 %2526, %v326_v0   ;;  %375 = vperm.xlu0 %2524, %v326_v0   ;;  %v427_v8 = vld [vmem:[%s3453_s2] sm:$0xff]  ;;  %v328_v18 = vand.u32 127, %v327_v16 }
  0x27   : > { %v514_v9 = vld [vmem:[%s3454_s3] sm:$0xff]  ;;  %684 = vmatprep.mubr.f32.mxu1 %v2636_v12  ;;  %613 = vmatprep.mubr.f32.mxu0 %v2636_v12 }
  0x28   : > { %v539_v10 = vld [vmem:[%s3457_s6] sm:$0x7]  ;;  %v331_v21 = vadd.s32 384, %v328_v18  ;;  %vm345_vm0 = vcmp.ge.s32.totalorder %v328_v18, 1  ;;  %vm340_vm1 = vcmp.lt.s32.totalorder %v328_v18, 1  ;;  %vm394_vm2 = vcmp.lt.s32.totalorder %v328_v18, 127 }
  0x29   : > { %v524_v11 = vld [vmem:[%s3455_s4] sm:$0xff] }
  0x2a   : > { %2525 = vset.pattern.permute.xlu0 %v2633_v4  ;;  %332 = vrot.lane.b32.xlu1 %v2771_v3, %s2634_s16  ;;  %vm402_vm3 = vcmp.lt.s32.totalorder %v331_v21, 511 }
  0x2b   : > { %363 = vperm.xlu0 %2525, %v326_v0   ;;  %2527 = vset.pattern.permute.xlu1 %v2633_v4 }
  0x2e   : > { %334 = vrot.lane.b32.xlu1 %v2774_v5, %s2634_s16 }
  0x2f   : > { %336 = vrot.lane.b32.xlu0 %v2776_v6, %s2634_s16 }
  0x32   : > { %338 = vrot.lane.b32.xlu1 %v2780_v7, %s2634_s16 }
  0x33   : > { %386 = vrot.lane.b32.xlu0 %v2771_v3, %s2635_s26 }
  0x36   : > { %392 = vrot.lane.b32.xlu1 %v2780_v7, %s2635_s26 }
  0x37   : > { %388 = vrot.lane.b32.xlu0 %v2774_v5, %s2635_s26 }
  0x3a   : > { %390 = vrot.lane.b32.xlu1 %v2776_v6, %s2635_s26 }
  0x3b   : > { %430 = vperm.xlu0 %2525, %v427_v8  }
  0x3e   : > { %517 = vperm.xlu1 %2527, %v514_v9  }
  0x3f   : > { %542 = vperm.xlu0 %2525, %v539_v10  }
  0x42   : > { %527 = vperm.xlu1 %2527, %v524_v11  }
  0xa1   : > { %v417_v13 = vpop.permute.xlu1 %416  ;;  %v376_v14 = vpop.permute.xlu0 %375 }
  0xa2   : > { %v378_v32 = vmul.f32 %v376_v14, %v2771_v3  ;;  %v381_v33 = vmul.f32 %v376_v14, %v2780_v7  ;;  %v379_v44 = vmul.f32 %v376_v14, %v2774_v5  ;;  %v380_v45 = vmul.f32 %v376_v14, %v2776_v6 }
  0xa5   : > { %v333_v15 = vpop.permute.xlu1 %332 }
  0xa6   : > { %v364_v17 = vpop.permute.xlu0 %363 }
  0xa9   : > { %v335_v19 = vpop.permute.xlu1 %334 }
  0xaa   : > { %v337_v20 = vpop.permute.xlu0 %336  ;;  %v343_v27 = vsel %vm340_vm1, %v333_v15, %v335_v19 }
  0xab   : > { %v342_v28 = vsel %vm340_vm1, %v335_v19, %v337_v20  ;;  %v367_v36 = vmul.f32 %v364_v17, %v343_v27 }
  0xac   : > { %v368_v37 = vmul.f32 %v364_v17, %v342_v28 }
  0xad   : > { %v339_v22 = vpop.permute.xlu1 %338  ;;  %v383_v52 = vadd.f32 %v379_v44, %v367_v36 }
  0xae   : > { %v341_v23 = vsel %vm340_vm1, %v337_v20, %v339_v22  ;;  %v344_v24 = vsel %vm340_vm1, %v339_v22, %v333_v15  ;;  %v387_v25 = vpop.permute.xlu0 %386  ;;  %v384_v53 = vadd.f32 %v380_v45, %v368_v37 }
  0xaf   : > { %v357_v26 = vsel %vm345_vm0, %v344_v24, 0.0  ;;  %v369_v30 = vmul.f32 %v364_v17, %v341_v23 }
  0xb0   : > { %v366_v29 = vmul.f32 %v364_v17, %v357_v26 }
  0xb1   : > { %v393_v31 = vpop.permute.xlu1 %392  ;;  %v385_v41 = vadd.f32 %v381_v33, %v369_v30 }
  0xb2   : > { %v398_v34 = vsel %vm394_vm2, %v393_v31, %v387_v25  ;;  %v389_v35 = vpop.permute.xlu0 %388  ;;  %v382_v40 = vadd.f32 %v378_v32, %v366_v29 }
  0xb3   : > { %v414_v38 = vsel %vm402_vm3, %v398_v34, 0.0  ;;  %v397_v39 = vsel %vm394_vm2, %v387_v25, %v389_v35 }
  0xb4   : > { %v422_v42 = vmul.f32 %v417_v13, %v414_v38  ;;  %v419_v43 = vmul.f32 %v417_v13, %v397_v39 }
  0xb5   : > { %v391_v46 = vpop.permute.xlu1 %390 }
  0xb6   : > { %v426_v47 = vadd.f32 %v422_v42, %v385_v41  ;;  %v423_v48 = vadd.f32 %v419_v43, %v382_v40  ;;  %v395_v49 = vsel %vm394_vm2, %v391_v46, %v393_v31  ;;  %v396_v50 = vsel %vm394_vm2, %v389_v35, %v391_v46  ;;  %v431_v51 = vpop.permute.xlu0 %430 }
  0xb7   : > { %v420_v54 = vmul.f32 %v417_v13, %v396_v50  ;;  %v421_v55 = vmul.f32 %v417_v13, %v395_v49 }
  0xb8   : > { %v433_v56 = vadd.f32 %v431_v51, %v423_v48  ;;  %v436_v57 = vadd.f32 %v431_v51, %v426_v47 }
  0xb9   : > { %v424_v58 = vadd.f32 %v420_v54, %v383_v52  ;;  %v425_v59 = vadd.f32 %v421_v55, %v384_v53 }
  0xba   : > { %v437_v60 = vrot.slane %v433_v56, 4  ;;  %v455_v61 = vrot.slane %v436_v57, 4 }
  0xbb   : > { %v434_v62 = vadd.f32 %v431_v51, %v424_v58  ;;  %v435_v63 = vadd.f32 %v431_v51, %v425_v59 }
  0xbc   : > { %v438_v0 = vadd.f32 %v437_v60, %v433_v56  ;;  %v456_v1 = vadd.f32 %v455_v61, %v436_v57 }
  0xbd   : > { %v443_v2 = vrot.slane %v434_v62, 4  ;;  %v449_v4 = vrot.slane %v435_v63, 4 }
  0xbe   : > { %v439_v8 = vrot.slane %v438_v0, 2  ;;  %v457_v9 = vrot.slane %v456_v1, 2 }
  0xbf   : > { %v444_v10 = vadd.f32 %v443_v2, %v434_v62  ;;  %v450_v11 = vadd.f32 %v449_v4, %v435_v63 }
  0xc0   : > { %v440_v14 = vadd.f32 %v439_v8, %v438_v0  ;;  %v458_v15 = vadd.f32 %v457_v9, %v456_v1 }
  0xc1   : > { %v445_v16 = vrot.slane %v444_v10, 2  ;;  %v451_v13 = vrot.slane %v450_v11, 2 }
  0xc2   : > { %v459_v17 = vrot.slane %v458_v15, 1  ;;  %v441_v18 = vrot.slane %v440_v14, 1 }
  0xc3   : > { %v452_v19 = vadd.f32 %v451_v13, %v450_v11  ;;  %v446_v20 = vadd.f32 %v445_v16, %v444_v10  ;;  %v518_v11 = vpop.permute.xlu1 %517 }
  0xc4   : > { %v460_v21 = vadd.f32 %v459_v17, %v458_v15  ;;  %v442_v22 = vadd.f32 %v441_v18, %v440_v14 }
  0xc5   : > { %v447_v23 = vrot.slane %v446_v20, 1  ;;  %v453_v24 = vrot.slane %v452_v19, 1 }
  0xc6   : > { %v465_v25 = vmul.f32 0.125, %v460_v21  ;;  %v462_v26 = vmul.f32 0.125, %v442_v22 }
  0xc7   : > { %v448_v27 = vadd.f32 %v447_v23, %v446_v20  ;;  %v454_v28 = vadd.f32 %v453_v24, %v452_v19  ;;  %v528_v13 = vpop.permute.xlu1 %527 }
  0xc8   : > { %v469_v29 = vsub.f32 %v436_v57, %v465_v25  ;;  %v466_v30 = vsub.f32 %v433_v56, %v462_v26 }
  0xc9   : > { %v463_v31 = vmul.f32 0.125, %v448_v27  ;;  %v464_v32 = vmul.f32 0.125, %v454_v28 }
  0xca   : > { %v473_v33 = vmul.f32 %v469_v29, %v469_v29  ;;  %v470_v34 = vmul.f32 %v466_v30, %v466_v30 }
  0xcb   : > { %v467_v35 = vsub.f32 %v434_v62, %v463_v31  ;;  %v468_v36 = vsub.f32 %v435_v63, %v464_v32 }
  0xcc   : > { %v492_v37 = vrot.slane %v473_v33, 4  ;;  %v474_v38 = vrot.slane %v470_v34, 4 }
  0xcd   : > { %v471_v39 = vmul.f32 %v467_v35, %v467_v35  ;;  %v472_v40 = vmul.f32 %v468_v36, %v468_v36 }
  0xce   : > { %v493_v41 = vadd.f32 %v492_v37, %v473_v33  ;;  %v475_v42 = vadd.f32 %v474_v38, %v470_v34 }
  0xcf   : > { %v480_v43 = vrot.slane %v471_v39, 4  ;;  %v486_v44 = vrot.slane %v472_v40, 4 }
  0xd0   : > { %v494_v45 = vrot.slane %v493_v41, 2  ;;  %v476_v46 = vrot.slane %v475_v42, 2 }
  0xd1   : > { %v481_v47 = vadd.f32 %v480_v43, %v471_v39  ;;  %v487_v48 = vadd.f32 %v486_v44, %v472_v40 }
  0xd2   : > { %v495_v49 = vadd.f32 %v494_v45, %v493_v41  ;;  %v477_v50 = vadd.f32 %v476_v46, %v475_v42 }
  0xd3   : > { %v482_v51 = vrot.slane %v481_v47, 2  ;;  %v488_v52 = vrot.slane %v487_v48, 2 }
  0xd4   : > { %v496_v53 = vrot.slane %v495_v49, 1  ;;  %v478_v54 = vrot.slane %v477_v50, 1 }
  0xd5   : > { %v483_v55 = vadd.f32 %v482_v51, %v481_v47  ;;  %v489_v56 = vadd.f32 %v488_v52, %v487_v48 }
  0xd6   : > { %v497_v57 = vadd.f32 %v496_v53, %v495_v49  ;;  %v479_v58 = vadd.f32 %v478_v54, %v477_v50 }
  0xd7   : > { %v484_v59 = vrot.slane %v483_v55, 1  ;;  %v490_v60 = vrot.slane %v489_v56, 1 }
  0xd8   : > { %v501_v61 = vmul.f32 0.125, %v497_v57  ;;  %v498_v62 = vmul.f32 0.125, %v479_v58 }
  0xd9   : > { %v485_v63 = vadd.f32 %v484_v59, %v483_v55  ;;  %v491_v0 = vadd.f32 %v490_v60, %v489_v56 }
  0xda   : > { %v505_v1 = vadd.f32 1e-05, %v501_v61  ;;  %v502_v2 = vadd.f32 1e-05, %v498_v62 }
  0xdb   : > { %v499_v4 = vmul.f32 0.125, %v485_v63  ;;  %v500_v8 = vmul.f32 0.125, %v491_v0 }
  0xdc   : > { %2528 = vrsqrt.f32 %v505_v1 }
  0xdd   : > { %v503_v9 = vadd.f32 1e-05, %v499_v4  ;;  %v504_v10 = vadd.f32 1e-05, %v500_v8  ;;  %2530 = vrsqrt.f32 %v502_v2 }
  0xdf   : > { %2532 = vrsqrt.f32 %v503_v9 }
  0xe0   : > { %2534 = vrsqrt.f32 %v504_v10 }
  0xe9   : > { %v2529_v14 = vpop.eup %2528 }
  0xea   : > { %v2531_v15 = vpop.eup %2530  ;;  %v513_v16 = vmul.f32 %v2529_v14, %v469_v29  ;;  %v538_v29 = vld [vmem:[%s3456_s5] sm:$0x7] }
  0xeb   : > { %v510_v17 = vmul.f32 %v2531_v15, %v466_v30  ;;  %v709_v30 = vld [vmem:[%s3458_s7] sm:$0xff] }
  0xec   : > { %v2533_v18 = vpop.eup %2532  ;;  %v523_v19 = vmul.f32 %v518_v11, %v513_v16 }
  0xed   : > { %v2535_v20 = vpop.eup %2534  ;;  %v511_v21 = vmul.f32 %v2533_v18, %v467_v35  ;;  %v520_v22 = vmul.f32 %v518_v11, %v510_v17 }
  0xee   : > { %v533_v23 = vadd.f32 %v528_v13, %v523_v19  ;;  %v512_v24 = vmul.f32 %v2535_v20, %v468_v36 }
  0xef   : > { %v521_v25 = vmul.f32 %v518_v11, %v511_v21  ;;  %v530_v28 = vadd.f32 %v528_v13, %v520_v22 }
  0xf0   : > { %v537_v26 = vmax.f32 %v533_v23, 0.0  ;;  %v522_v27 = vmul.f32 %v518_v11, %v512_v24 }
  0xf1   : > { %v531_v31 = vadd.f32 %v528_v13, %v521_v25  ;;  %v534_v37 = vmax.f32 %v530_v28, 0.0 }
  0xf2   : > { %650 = vmatprep.subr.mxu1 %v537_v26  ;;  %v532_v32 = vadd.f32 %v528_v13, %v522_v27 }
  0xf3   : > { %v535_v33 = vmax.f32 %v531_v31, 0.0 }
  0xf4   : > { %v536_v34 = vmax.f32 %v532_v32, 0.0 }
  0xf5   : > { %579 = vmatprep.subr.mxu0 %v535_v33 }
  0xf6   : > { %651 = vmatpush1.msra.mxu1 %v536_v34  ;;  %580 = vmatpush1.msra.mxu0 %v534_v37 }
  0xf7   : > { %2155 = vmatmul.mubr.msk.f32.vlgmr.msra.gmra.mxu1 %vm545_vm4, %v538_v29  ;;  %2154 = vmatmul.mubr.msk.f32.vlgmr.msra.gmra.mxu0 %vm545_vm4, %v538_v29 }
  0xf8   : > { %755 = vmatprep.subr.mxu0 %v2774_v5  ;;  %838 = vmatprep.subr.mxu1 %v2780_v7  ;;  %v710_v5 = vld [vmem:[%s3458_s7 + $0x8] sm:$0xff] }
  0xf9   : > { %756 = vmatpush1.msra.mxu0 %v2771_v3  ;;  %839 = vmatpush1.msra.mxu1 %v2776_v6  ;;  %v711_v3 = vld [vmem:[%s3458_s7 + $0x10] sm:$0xff]  ;;  %v543_v6 = vpop.permute.xlu0 %542 }
  0xfa   : > { %872 = vmatprep.mubr.f32.mxu1 %v2636_v12  ;;  %789 = vmatprep.mubr.f32.mxu0 %v2636_v12 }
  0xfb   : > { %2163 = vmatmul.mubr.msk.f32.vlgmr.msra.gmra.mxu1 %vm545_vm4, %v709_v30  ;;  %2160 = vmatmul.mubr.msk.f32.vlgmr.msra.gmra.mxu0 %vm545_vm4, %v709_v30 }
  0xfc   : > { %878 = vmatprep.mubr.f32.mxu1 %v2636_v12  ;;  %795 = vmatprep.mubr.f32.mxu0 %v2636_v12 }
  0xff   : > { %2164 = vmatmul.mubr.msk.f32.gmra.mxu1 %vm545_vm4, %v710_v5  ;;  %2161 = vmatmul.mubr.msk.f32.gmra.mxu0 %vm545_vm4, %v710_v5 }
 0x100   : > { %884 = vmatprep.mubr.f32.mxu1 %v2636_v12  ;;  %801 = vmatprep.mubr.f32.mxu0 %v2636_v12 }
 0x103   : > { %2165 = vmatmul.mubr.msk.f32.gmra.mxu1 %vm545_vm4, %v711_v3  ;;  %2162 = vmatmul.mubr.msk.f32.gmra.mxu0 %vm545_vm4, %v711_v3 }
 0x1b7   : > { %v686_v7 = vpop.f32.mrf.mxu1  ;;  %v615_v35 = vpop.f32.mrf.mxu0 }
 0x1b8   : > { %v687_v36 = vadd.f32 %v686_v7, %v543_v6  ;;  %v616_v38 = vadd.f32 %v615_v35, %v543_v6 }
 0x1b9   : > { %v688_v39 = vpop.f32.mrf.mxu1  ;;  %v617_v40 = vpop.f32.mrf.mxu0 }
 0x1ba   : > { %v689_v41 = vadd.f32 %v688_v39, %v543_v6  ;;  %v618_v42 = vadd.f32 %v617_v40, %v543_v6  ;;  %v2158_v12 = vclamps-f32 %v687_v36, 124.0  ;;  %v2156_v45 = vclamps-f32 %v616_v38, 124.0 }
 0x1bb   : > { %v874_v43 = vpop.f32.mrf.mxu1  ;;  %v791_v44 = vpop.f32.mrf.mxu0 }
 0x1bc   : > { %v2159_v46 = vclamps-f32 %v689_v41, 124.0  ;;  %v2157_v47 = vclamps-f32 %v618_v42, 124.0  ;;  %893 = vst [vmem:[#allocation3 + $0x10] sm:$0xff] %v874_v43  ;;  %891 = vst [vmem:[#allocation3] sm:$0xff] %v791_v44 }
 0x1bd   : > { %v876_v48 = vpop.f32.mrf.mxu1  ;;  %v793_v49 = vpop.f32.mrf.mxu0 }
 0x1be   : > { %v704_v50 = vcombine.low %v2158_v12, %v2159_v46  ;;  %v703_v51 = vcombine.low %v2156_v45, %v2157_v47  ;;  %894 = vst [vmem:[#allocation3 + $0x18] sm:$0xff] %v876_v48  ;;  %892 = vst [vmem:[#allocation3 + $0x8] sm:$0xff] %v793_v49 }
 0x1bf   : > { %v880_v52 = vpop.f32.mrf.mxu1  ;;  %v797_v53 = vpop.f32.mrf.mxu0 }
 0x1c0   : > { %708 = vst [vmem:[#allocation2 + $0x8] sm:$0x77] %v704_v50  ;;  %707 = vst [vmem:[#allocation2] sm:$0x77] %v703_v51 }
 0x1c1   : > { %897 = vst [vmem:[#allocation3 + $0x30] sm:$0xff] %v880_v52  ;;  %895 = vst [vmem:[#allocation3 + $0x20] sm:$0xff] %v797_v53  ;;  %v882_v54 = vpop.f32.mrf.mxu1  ;;  %v799_v55 = vpop.f32.mrf.mxu0 }
 0x1c2   : > { %898 = vst [vmem:[#allocation3 + $0x38] sm:$0xff] %v882_v54  ;;  %896 = vst [vmem:[#allocation3 + $0x28] sm:$0xff] %v799_v55 }
 0x1c3   : > { %v886_v56 = vpop.f32.mrf.mxu1  ;;  %v803_v57 = vpop.f32.mrf.mxu0 }
 0x1c4   : > { %901 = vst [vmem:[#allocation3 + $0x50] sm:$0xff] %v886_v56  ;;  %899 = vst [vmem:[#allocation3 + $0x40] sm:$0xff] %v803_v57 }
 0x1c5   : > { %v888_v58 = vpop.f32.mrf.mxu1  ;;  %v805_v59 = vpop.f32.mrf.mxu0 }
 0x1c6   : > { %902 = vst [vmem:[#allocation3 + $0x58] sm:$0xff] %v888_v58  ;;  %900 = vst [vmem:[#allocation3 + $0x48] sm:$0xff] %v805_v59 }
 0x1c7 PF: > { %s2840_s16 = sshll.u32 %s2613_s30, 7  ;;  %v909_v60 = vlaneseq  ;;  %v3464_v61 = vmov 0.0   ;;  %vm2638_vm5 = vmmov 0  }
 0x1c8   : > { %s2167_s24 = sadd.s32 4294967168, %s2840_s16  ;;  %2340 = vmatprep.subr.mxu1 %v3464_v61  ;;  %2372 = vmatprep.mubr.msk.f32.mxu1 %vm2638_vm5, %v3464_v61  ;;  %s1011_s20 = sshra.s32 %s2840_s16, 7 }
 0x1c9   : > { %p905_p0 = scmp.gt.s32.totalorder %s2167_s24, 0  ;;  %p2168_p1 = scmp.lt.s32.totalorder %s2167_s24, 128  ;;  %v2846_v62 = vshrl.u32 %v909_v60, 7  ;;  %v1007_v63 = vand.u32 127, %v909_v60 }
 0x1ca   : > { %s2173_s13 = sadd.s32 4294967295, %s2840_s16  ;;  %s2855_s14 = sshll.u32 %s1011_s20, 2 }
 0x1cb   : > { %s906_s26 = scalar_select %p905_p0, %s2167_s24, 0  ;;  %v941_v0 = vadd.s32 248, %v2846_v62  ;;  %v2850_v1 = vcvt.s32.f32 %v1007_v63  ;;  %v1230_v2 = vsub.s32 1, %v2846_v62  ;;  %v925_v4 = vadd.s32 120, %v2846_v62 }
 0x1cc   : > { %v940_v8 = vadd.s32 240, %v2846_v62  ;;  %v924_v9 = vadd.s32 112, %v2846_v62  ;;  %v957_v10 = vadd.s32 376, %v2846_v62  ;;  %v939_v11 = vadd.s32 232, %v2846_v62 }
 0x1cd   : > { %s3549_s26 = smov (!%p2168_p1, %s906_s26), 128  ;;  %v2862_v14 = vcvt.s32.f32 %v941_v0  ;;  %v2864_v15 = vcvt.s32.f32 %v925_v4  ;;  %v923_v16 = vadd.s32 104, %v2846_v62  ;;  %v956_v13 = vadd.s32 368, %v2846_v62 }
 0x1ce   : > { %v2868_v17 = vcvt.s32.f32 %v940_v8  ;;  %v2870_v18 = vcvt.s32.f32 %v924_v9  ;;  %v2872_v19 = vcvt.s32.f32 %v957_v10  ;;  %v2874_v20 = vcvt.s32.f32 %v939_v11  ;;  %s2876_s21 = ssub.s32 %s2173_s13, %s3549_s26  ;;  %s1216_s22 = sshra.s32 %s3549_s26, 7 }
 0x1cf   : > { %3493 = vst [vmem:[#allocation8_spill] sm:$0xff] %v2864_v15  ;;  %v2878_v21 = vcvt.s32.f32 %v923_v16  ;;  %v2880_v22 = vcvt.s32.f32 %v956_v13  ;;  %v938_v23 = vadd.s32 224, %v2846_v62  ;;  %v922_v24 = vadd.s32 96, %v2846_v62  ;;  %s1223_s17 = sadd.s32 1, %s2876_s21  ;;  %s2175_s16 = sshll.u32 %s1216_s22, 3 }
 0x1d0   : > { %3494 = vst [vmem:[#allocation9_spill] sm:$0xff] %v2868_v17  ;;  %3495 = vst [vmem:[#allocation10_spill] sm:$0xff] %v2870_v18  ;;  %v955_v25 = vadd.s32 360, %v2846_v62  ;;  %v937_v26 = vadd.s32 216, %v2846_v62  ;;  %v921_v27 = vadd.s32 88, %v2846_v62  ;;  %v954_v28 = vadd.s32 352, %v2846_v62  ;;  %s1224_s24 = scvt.s32.f32 %s1223_s17  ;;  %s1016_s13 = scvt.s32.f32 %s2876_s21 }
 0x1d1   : > { %3496 = vst [vmem:[#allocation11_spill] sm:$0xff] %v2872_v19  ;;  %3497 = vst [vmem:[#allocation12_spill] sm:$0xff] %v2874_v20  ;;  %v2889_v31 = vcvt.s32.f32 %v938_v23  ;;  %v2891_v32 = vcvt.s32.f32 %v922_v24  ;;  %v936_v33 = vadd.s32 208, %v2846_v62  ;;  %v920_v34 = vadd.s32 80, %v2846_v62  ;;  %s2903_s20 = scalar_lea.vmem [#allocation3], %s2175_s16  ;;  %s1014_s26 = scalar_lea.vmem [#allocation2], %s2855_s14 }
 0x1d2   : > { %3498 = vst [vmem:[#allocation13_spill] sm:$0xff] %v2878_v21  ;;  %3499 = vst [vmem:[#allocation14_spill] sm:$0xff] %v2880_v22  ;;  %v2895_v37 = vcvt.s32.f32 %v955_v25  ;;  %v2897_v29 = vcvt.s32.f32 %v937_v26  ;;  %v2899_v30 = vcvt.s32.f32 %v921_v27  ;;  %v2901_v5 = vcvt.s32.f32 %v954_v28  ;;  %v1425_v3 = vld [vmem:[%s2903_s20 + $0x28] sm:$0xff]  ;;  %v2909_v6 = vld [vmem:[%s1014_s26] sm:$0x7]  ;;  %s1707_s22 = sadd.s32 2, %s2876_s21 }
 0x1d3   : > { %v1225_v7 = vstv %s1224_s24  ;;  %v2911_v35 = vcvt.s32.f32 %v936_v33  ;;  %v2913_v36 = vcvt.s32.f32 %v920_v34  ;;  %v953_v38 = vadd.s32 344, %v2846_v62  ;;  %1491 = vmatprep.mubr.f32.mxu0 %v1425_v3  ;;  %s1708_s21 = scvt.s32.f32 %s1707_s22  ;;  %s2177_s14 = sshll.u32 %s2617_s9, 2 }
 0x1d4   : > { %v1226_v39 = vadd.f32 %v1225_v7, %v2850_v1  ;;  %v935_v40 = vadd.s32 200, %v2846_v62  ;;  %v919_v41 = vadd.s32 72, %v2846_v62  ;;  %v952_v42 = vadd.s32 336, %v2846_v62  ;;  %s2065_s17 = sadd.s32 %s2613_s30, %s2177_s14  ;;  %s3531_s24 = scalar_lea.vmem [#allocation4], %s2760_s25 }
 0x1d5   : > { %v2920_v43 = vcvt.s32.f32 %v953_v38  ;;  %v934_v44 = vadd.s32 192, %v2846_v62  ;;  %v918_v12 = vadd.s32 64, %v2846_v62  ;;  %v951_v45 = vadd.s32 328, %v2846_v62  ;;  %s2178_s16 = sshll.u32 %s2065_s17, 7  ;;  %s3532_s22 = smov %s3531_s24 }
 0x1d6   : > { %v1227_v46 = vadd.f32 %v1226_v39, %v2909_v6  ;;  %v2926_v47 = vcvt.s32.f32 %v935_v40  ;;  %v2928_v48 = vcvt.s32.f32 %v919_v41  ;;  %v2930_v49 = vcvt.s32.f32 %v952_v42  ;;  %s2067_s9 = scalar_lea.hbm %s3459_s8, %s2178_s16  ;;  %s2639_s17 = smov [#allocation4]  }
 0x1d7   : > { %v2932_v50 = vcvt.s32.f32 %v934_v44  ;;  %v2934_v51 = vcvt.s32.f32 %v918_v12  ;;  %v2936_v52 = vcvt.s32.f32 %v951_v45  ;;  %v933_v53 = vadd.s32 184, %v2846_v62 }
 0x1d8   : > { %v2941_v54 = vrot.slane %v1227_v46, %v1230_v2  ;;  %v2944_v55 = vadd.s32 56, %v2846_v62  ;;  %v2947_v56 = vadd.s32 320, %v2846_v62  ;;  %v2950_v57 = vadd.s32 176, %v2846_v62 }
 0x1d9   : > { %v2952_v58 = vcvt.s32.f32 %v933_v53  ;;  %v2955_v59 = vadd.s32 48, %v2846_v62  ;;  %v2958_v60 = vadd.s32 312, %v2846_v62  ;;  %v2961_v63 = vadd.s32 168, %v2846_v62 }
 0x1da   : > { %v1263_v0 = vsub.f32 %v2862_v14, %v2941_v54  ;;  %v1247_v2 = vsub.f32 %v2864_v15, %v2941_v54  ;;  %v1262_v4 = vsub.f32 %v2868_v17, %v2941_v54  ;;  %v1246_v8 = vsub.f32 %v2870_v18, %v2941_v54 }
 0x1db   : > { %v1279_v9 = vsub.f32 %v2872_v19, %v2941_v54  ;;  %v1261_v10 = vsub.f32 %v2874_v20, %v2941_v54  ;;  %v1245_v11 = vsub.f32 %v2878_v21, %v2941_v54  ;;  %v1278_v16 = vsub.f32 %v2880_v22, %v2941_v54 }
 0x1dc   : > { %v1311_v13 = vand.u32 2147483647, %v1263_v0  ;;  %v1295_v23 = vand.u32 2147483647, %v1247_v2  ;;  %v1310_v24 = vand.u32 2147483647, %v1262_v4  ;;  %v1260_v25 = vsub.f32 %v2889_v31, %v2941_v54 }
 0x1dd   : > { %v1294_v26 = vand.u32 2147483647, %v1246_v8  ;;  %v1327_v27 = vand.u32 2147483647, %v1279_v9  ;;  %v1309_v28 = vand.u32 2147483647, %v1261_v10  ;;  %v1244_v33 = vsub.f32 %v2891_v32, %v2941_v54 }
 0x1de   : > { %v1359_v34 = vsub.f32 1.0, %v1311_v13  ;;  %v1343_v3 = vsub.f32 1.0, %v1295_v23  ;;  %v1358_v7 = vsub.f32 1.0, %v1310_v24  ;;  %v1293_v38 = vand.u32 2147483647, %v1245_v11 }
 0x1df   : > { %v1342_v39 = vsub.f32 1.0, %v1294_v26  ;;  %v1375_v40 = vsub.f32 1.0, %v1327_v27  ;;  %v1357_v41 = vsub.f32 1.0, %v1309_v28  ;;  %v1326_v42 = vand.u32 2147483647, %v1278_v16 }
 0x1e0   : > { %v1407_v44 = vmax.f32 %v1359_v34, 0.0  ;;  %v1391_v12 = vmax.f32 %v1343_v3, 0.0  ;;  %v1406_v45 = vmax.f32 %v1358_v7, 0.0  ;;  %v1341_v46 = vsub.f32 1.0, %v1293_v38 }
 0x1e1   : > { %v1390_v53 = vmax.f32 %v1342_v39, 0.0  ;;  %v1423_v0 = vmax.f32 %v1375_v40, 0.0  ;;  %v1405_v2 = vmax.f32 %v1357_v41, 0.0  ;;  %v1374_v4 = vsub.f32 1.0, %v1326_v42 }
 0x1e2   : > { %2184 = vmatprep.subr.mxu0 %v1407_v44  ;;  %v1389_v8 = vmax.f32 %v1341_v46, 0.0  ;;  %v1308_v9 = vand.u32 2147483647, %v1260_v25  ;;  %v1292_v10 = vand.u32 2147483647, %v1244_v33  ;;  %v1277_v13 = vsub.f32 %v2895_v37, %v2941_v54 }
 0x1e3   : > { %2185 = vmatpush3.msra.mxu0 %v1391_v12  ;;  %2341 = vmatpush3.msra.mxu1 %v1423_v0  ;;  %v1422_v11 = vmax.f32 %v1374_v4, 0.0  ;;  %v1259_v16 = vsub.f32 %v2897_v29, %v2941_v54  ;;  %v1243_v23 = vsub.f32 %v2899_v30, %v2941_v54  ;;  %v1276_v24 = vsub.f32 %v2901_v5, %v2941_v54 }
 0x1e4   : > { %2186 = vmatprep.subr.mxu0 %v1406_v45  ;;  %2342 = vmatprep.subr.mxu1 %v3464_v61  ;;  %v1356_v25 = vsub.f32 1.0, %v1308_v9  ;;  %v1340_v26 = vsub.f32 1.0, %v1292_v10  ;;  %v1325_v27 = vand.u32 2147483647, %v1277_v13  ;;  %v1258_v28 = vsub.f32 %v2911_v35, %v2941_v54 }
 0x1e5   : > { %2187 = vmatpush3.msra.mxu0 %v1390_v53  ;;  %2343 = vmatpush3.msra.mxu1 %v1422_v11  ;;  %v1307_v33 = vand.u32 2147483647, %v1259_v16  ;;  %v1291_v34 = vand.u32 2147483647, %v1243_v23  ;;  %v1324_v3 = vand.u32 2147483647, %v1276_v24  ;;  %v1242_v7 = vsub.f32 %v2913_v36, %v2941_v54 }
 0x1e6   : > { %2188 = vmatprep.subr.mxu0 %v1405_v2  ;;  %v1404_v38 = vmax.f32 %v1356_v25, 0.0  ;;  %2344 = vmatprep.subr.mxu1 %v3464_v61  ;;  %v1388_v39 = vmax.f32 %v1340_v26, 0.0  ;;  %v1373_v40 = vsub.f32 1.0, %v1325_v27  ;;  %v1306_v41 = vand.u32 2147483647, %v1258_v28 }
 0x1e7   : > { %2189 = vmatpush3.msra.mxu0 %v1389_v8  ;;  %v1355_v42 = vsub.f32 1.0, %v1307_v33  ;;  %v1339_v44 = vsub.f32 1.0, %v1291_v34  ;;  %v1372_v12 = vsub.f32 1.0, %v1324_v3  ;;  %v1290_v45 = vand.u32 2147483647, %v1242_v7 }
 0x1e8   : > { %2190 = vmatprep.subr.mxu0 %v1404_v38  ;;  %v1421_v46 = vmax.f32 %v1373_v40, 0.0  ;;  %v1354_v53 = vsub.f32 1.0, %v1306_v41  ;;  %v1275_v0 = vsub.f32 %v2920_v43, %v2941_v54  ;;  %v1257_v2 = vsub.f32 %v2926_v47, %v2941_v54 }
 0x1e9   : > { %2191 = vmatpush3.msra.mxu0 %v1388_v39  ;;  %v1403_v4 = vmax.f32 %v1355_v42, 0.0  ;;  %v1387_v9 = vmax.f32 %v1339_v44, 0.0  ;;  %v1420_v10 = vmax.f32 %v1372_v12, 0.0  ;;  %v1338_v13 = vsub.f32 1.0, %v1290_v45 }
 0x1ea   : > { %2345 = vmatpush3.msra.mxu1 %v1421_v46  ;;  %v1402_v8 = vmax.f32 %v1354_v53, 0.0  ;;  %v1323_v11 = vand.u32 2147483647, %v1275_v0  ;;  %v1305_v16 = vand.u32 2147483647, %v1257_v2  ;;  %v1241_v23 = vsub.f32 %v2928_v48, %v2941_v54 }
 0x1eb   : > { %2192 = vmatprep.subr.mxu0 %v1403_v4  ;;  %2346 = vmatprep.subr.mxu1 %v3464_v61  ;;  %v1386_v24 = vmax.f32 %v1338_v13, 0.0  ;;  %v1274_v25 = vsub.f32 %v2930_v49, %v2941_v54  ;;  %v1256_v26 = vsub.f32 %v2932_v50, %v2941_v54  ;;  %v1240_v27 = vsub.f32 %v2934_v51, %v2941_v54 }
 0x1ec   : > { %2193 = vmatpush3.msra.mxu0 %v1387_v9  ;;  %2347 = vmatpush3.msra.mxu1 %v1420_v10  ;;  %v1371_v28 = vsub.f32 1.0, %v1323_v11  ;;  %v1353_v33 = vsub.f32 1.0, %v1305_v16  ;;  %v1289_v34 = vand.u32 2147483647, %v1241_v23  ;;  %v1273_v3 = vsub.f32 %v2936_v52, %v2941_v54 }
 0x1ed   : > { %2194 = vmatprep.subr.mxu0 %v1402_v8  ;;  %2348 = vmatprep.subr.mxu1 %v3464_v61  ;;  %v1322_v7 = vand.u32 2147483647, %v1274_v25  ;;  %v1304_v38 = vand.u32 2147483647, %v1256_v26  ;;  %v1288_v39 = vand.u32 2147483647, %v1240_v27  ;;  %v1255_v40 = vsub.f32 %v2952_v58, %v2941_v54 }
 0x1ee   : > { %2195 = vmatpush3.msra.mxu0 %v1386_v24  ;;  %v1419_v41 = vmax.f32 %v1371_v28, 0.0  ;;  %v1401_v42 = vmax.f32 %v1353_v33, 0.0  ;;  %v1337_v44 = vsub.f32 1.0, %v1289_v34  ;;  %v1321_v12 = vand.u32 2147483647, %v1273_v3 }
 0x1ef   : > { %v1370_v45 = vsub.f32 1.0, %v1322_v7  ;;  %v1352_v46 = vsub.f32 1.0, %v1304_v38  ;;  %v1336_v53 = vsub.f32 1.0, %v1288_v39  ;;  %v1303_v0 = vand.u32 2147483647, %v1255_v40 }
 0x1f0   : > { %2349 = vmatpush3.msra.mxu1 %v1419_v41  ;;  %2196 = vmatprep.subr.mxu0 %v1401_v42  ;;  %v1385_v2 = vmax.f32 %v1337_v44, 0.0  ;;  %v1369_v4 = vsub.f32 1.0, %v1321_v12  ;;  %v3016_v9 = vcvt.s32.f32 %v2944_v55  ;;  %v3019_v10 = vcvt.s32.f32 %v2947_v56 }
 0x1f1   : > { %2350 = vmatprep.subr.mxu1 %v3464_v61  ;;  %v1418_v13 = vmax.f32 %v1370_v45, 0.0  ;;  %v1400_v8 = vmax.f32 %v1352_v46, 0.0  ;;  %v1384_v11 = vmax.f32 %v1336_v53, 0.0  ;;  %v1351_v16 = vsub.f32 1.0, %v1303_v0 }
 0x1f2   : > { %2197 = vmatpush3.msra.mxu0 %v1385_v2  ;;  %v1417_v23 = vmax.f32 %v1369_v4, 0.0  ;;  %v1239_v24 = vsub.f32 %v3016_v9, %v2941_v54  ;;  %v1272_v25 = vsub.f32 %v3019_v10, %v2941_v54  ;;  %v3027_v55 = vcvt.s32.f32 %v2950_v57 }
 0x1f3   : > { %2351 = vmatpush3.msra.mxu1 %v1418_v13  ;;  %2198 = vmatprep.subr.mxu0 %v1400_v8  ;;  %v1399_v56 = vmax.f32 %v1351_v16, 0.0  ;;  %v3030_v26 = vcvt.s32.f32 %v2955_v59  ;;  %v3033_v27 = vcvt.s32.f32 %v2958_v60  ;;  %v3036_v28 = vcvt.s32.f32 %v2961_v63 }
 0x1f4   : > { %2352 = vmatprep.subr.mxu1 %v3464_v61  ;;  %2199 = vmatpush3.msra.mxu0 %v1384_v11  ;;  %v1287_v33 = vand.u32 2147483647, %v1239_v24  ;;  %v1320_v34 = vand.u32 2147483647, %v1272_v25  ;;  %v1254_v57 = vsub.f32 %v3027_v55, %v2941_v54  ;;  %v915_v3 = vadd.s32 40, %v2846_v62 }
 0x1f5   : > { %2353 = vmatpush3.msra.mxu1 %v1417_v23  ;;  %2200 = vmatprep.subr.mxu0 %v1399_v56  ;;  %v1238_v59 = vsub.f32 %v3030_v26, %v2941_v54  ;;  %v1271_v60 = vsub.f32 %v3033_v27, %v2941_v54  ;;  %v1253_v63 = vsub.f32 %v3036_v28, %v2941_v54  ;;  %v948_v7 = vadd.s32 304, %v2846_v62 }
 0x1f6   : > { %2354 = vmatprep.subr.mxu1 %v3464_v61  ;;  %v1335_v38 = vsub.f32 1.0, %v1287_v33  ;;  %v1368_v39 = vsub.f32 1.0, %v1320_v34  ;;  %v1302_v40 = vand.u32 2147483647, %v1254_v57  ;;  %v3050_v41 = vcvt.s32.f32 %v915_v3 }
 0x1f7   : > { %v1286_v42 = vand.u32 2147483647, %v1238_v59  ;;  %v1319_v44 = vand.u32 2147483647, %v1271_v60  ;;  %v1301_v12 = vand.u32 2147483647, %v1253_v63  ;;  %v3052_v45 = vcvt.s32.f32 %v948_v7 }
 0x1f8   : > { %v1383_v46 = vmax.f32 %v1335_v38, 0.0  ;;  %v1416_v53 = vmax.f32 %v1368_v39, 0.0  ;;  %v1350_v0 = vsub.f32 1.0, %v1302_v40  ;;  %v1237_v2 = vsub.f32 %v3050_v41, %v2941_v54 }
 0x1f9   : > { %v1334_v4 = vsub.f32 1.0, %v1286_v42  ;;  %v1367_v13 = vsub.f32 1.0, %v1319_v44  ;;  %v1349_v8 = vsub.f32 1.0, %v1301_v12  ;;  %v1270_v11 = vsub.f32 %v3052_v45, %v2941_v54 }
 0x1fa   : > { %2201 = vmatpush3.msra.mxu0 %v1383_v46  ;;  %2355 = vmatpush3.msra.mxu1 %v1416_v53  ;;  %v1398_v16 = vmax.f32 %v1350_v0, 0.0  ;;  %v1285_v23 = vand.u32 2147483647, %v1237_v2  ;;  %v930_v24 = vadd.s32 160, %v2846_v62  ;;  %v914_v25 = vadd.s32 32, %v2846_v62 }
 0x1fb   : > { %2356 = vmatprep.subr.mxu1 %v3464_v61  ;;  %v1382_v56 = vmax.f32 %v1334_v4, 0.0  ;;  %v1415_v33 = vmax.f32 %v1367_v13, 0.0  ;;  %v1397_v34 = vmax.f32 %v1349_v8, 0.0  ;;  %v1318_v57 = vand.u32 2147483647, %v1270_v11 }
 0x1fc   : > { %2202 = vmatprep.subr.mxu0 %v1398_v16  ;;  %v1333_v3 = vsub.f32 1.0, %v1285_v23  ;;  %v3061_v59 = vcvt.s32.f32 %v930_v24  ;;  %v3063_v60 = vcvt.s32.f32 %v914_v25  ;;  %v947_v63 = vadd.s32 296, %v2846_v62 }
 0x1fd   : > { %2203 = vmatpush3.msra.mxu0 %v1382_v56  ;;  %2357 = vmatpush3.msra.mxu1 %v1415_v33  ;;  %v1366_v7 = vsub.f32 1.0, %v1318_v57  ;;  %v929_v38 = vadd.s32 152, %v2846_v62  ;;  %v913_v39 = vadd.s32 24, %v2846_v62  ;;  %v946_v40 = vadd.s32 288, %v2846_v62 }
 0x1fe   : > { %2204 = vmatprep.subr.mxu0 %v1397_v34  ;;  %2358 = vmatprep.subr.mxu1 %v3464_v61  ;;  %v1381_v42 = vmax.f32 %v1333_v3, 0.0  ;;  %v1252_v44 = vsub.f32 %v3061_v59, %v2941_v54  ;;  %v1236_v12 = vsub.f32 %v3063_v60, %v2941_v54  ;;  %v3074_v46 = vcvt.s32.f32 %v947_v63 }
 0x1ff   : > { %v1414_v53 = vmax.f32 %v1366_v7, 0.0  ;;  %v3076_v0 = vcvt.s32.f32 %v929_v38  ;;  %v3078_v2 = vcvt.s32.f32 %v913_v39  ;;  %v3080_v4 = vcvt.s32.f32 %v946_v40 }
 0x200   : > { %2205 = vmatpush3.msra.mxu0 %v1381_v42  ;;  %v1300_v13 = vand.u32 2147483647, %v1252_v44  ;;  %v1284_v8 = vand.u32 2147483647, %v1236_v12  ;;  %v1269_v11 = vsub.f32 %v3074_v46, %v2941_v54  ;;  %v928_v16 = vadd.s32 144, %v2846_v62 }
 0x201   : > { %3500 = vst [vmem:[#allocation15_spill] sm:$0xff] %v3080_v4  ;;  %2359 = vmatpush3.msra.mxu1 %v1414_v53  ;;  %v1251_v23 = vsub.f32 %v3076_v0, %v2941_v54  ;;  %v1235_v24 = vsub.f32 %v3078_v2, %v2941_v54  ;;  %v1268_v25 = vsub.f32 %v3080_v4, %v2941_v54  ;;  %v912_v56 = vadd.s32 16, %v2846_v62 }
 0x202   : > { %v1348_v33 = vsub.f32 1.0, %v1300_v13  ;;  %2360 = vmatprep.subr.mxu1 %v3464_v61  ;;  %v1332_v34 = vsub.f32 1.0, %v1284_v8  ;;  %v1317_v57 = vand.u32 2147483647, %v1269_v11  ;;  %v3093_v3 = vcvt.s32.f32 %v928_v16 }
 0x203   : > { %v1299_v63 = vand.u32 2147483647, %v1251_v23  ;;  %v1283_v7 = vand.u32 2147483647, %v1235_v24  ;;  %v1316_v38 = vand.u32 2147483647, %v1268_v25  ;;  %v3095_v39 = vcvt.s32.f32 %v912_v56 }
 0x204   : > { %v1396_v40 = vmax.f32 %v1348_v33, 0.0  ;;  %v1380_v42 = vmax.f32 %v1332_v34, 0.0  ;;  %v1365_v44 = vsub.f32 1.0, %v1317_v57  ;;  %v1250_v12 = vsub.f32 %v3093_v3, %v2941_v54 }
 0x205   : > { %3501 = vst [vmem:[#allocation16_spill] sm:$0xff] %v3095_v39  ;;  %v1347_v53 = vsub.f32 1.0, %v1299_v63  ;;  %v1331_v4 = vsub.f32 1.0, %v1283_v7  ;;  %v1364_v13 = vsub.f32 1.0, %v1316_v38  ;;  %v1234_v8 = vsub.f32 %v3095_v39, %v2941_v54 }
 0x206   : > { %2206 = vmatprep.subr.mxu0 %v1396_v40  ;;  %v1413_v11 = vmax.f32 %v1365_v44, 0.0  ;;  %v1298_v16 = vand.u32 2147483647, %v1250_v12  ;;  %v945_v23 = vadd.s32 280, %v2846_v62  ;;  %v927_v24 = vadd.s32 136, %v2846_v62 }
 0x207   : > { %2207 = vmatpush3.msra.mxu0 %v1380_v42  ;;  %v1395_v25 = vmax.f32 %v1347_v53, 0.0  ;;  %v1379_v56 = vmax.f32 %v1331_v4, 0.0  ;;  %v1412_v33 = vmax.f32 %v1364_v13, 0.0  ;;  %v1282_v34 = vand.u32 2147483647, %v1234_v8 }
 0x208   : > { %2361 = vmatpush3.msra.mxu1 %v1413_v11  ;;  %v1346_v57 = vsub.f32 1.0, %v1298_v16  ;;  %v3103_v63 = vcvt.s32.f32 %v945_v23  ;;  %v3105_v7 = vcvt.s32.f32 %v927_v24  ;;  %v911_v38 = vadd.s32 8, %v2846_v62 }
 0x209   : > { %2208 = vmatprep.subr.mxu0 %v1395_v25  ;;  %2362 = vmatprep.subr.mxu1 %v3464_v61  ;;  %v1330_v40 = vsub.f32 1.0, %v1282_v34  ;;  %v944_v44 = vadd.s32 272, %v2846_v62  ;;  %v926_v42 = vadd.s32 128, %v2846_v62  ;;  %v3112_v4 = vcvt.s32.f32 %v2846_v62 }
 0x20a   : > { %3502 = vst [vmem:[#allocation17_spill] sm:$0xff] %v3103_v63  ;;  %3503 = vst [vmem:[#allocation18_spill] sm:$0xff] %v3105_v7  ;;  %2209 = vmatpush3.msra.mxu0 %v1379_v56  ;;  %2363 = vmatpush3.msra.mxu1 %v1412_v33  ;;  %v1394_v12 = vmax.f32 %v1346_v57, 0.0  ;;  %v1267_v53 = vsub.f32 %v3103_v63, %v2941_v54  ;;  %v1249_v13 = vsub.f32 %v3105_v7, %v2941_v54 }
 0x20b   : > { %3504 = vst [vmem:[#allocation19_spill] sm:$0xff] %v3112_v4  ;;  %v3119_v8 = vcvt.s32.f32 %v911_v38  ;;  %2364 = vmatprep.subr.mxu1 %v3464_v61  ;;  %v1378_v11 = vmax.f32 %v1330_v40, 0.0  ;;  %v3122_v16 = vcvt.s32.f32 %v944_v44  ;;  %v3124_v23 = vcvt.s32.f32 %v926_v42 }
 0x20c   : > { %v1232_v24 = vsub.f32 %v3112_v4, %v2941_v54  ;;  %2210 = vmatprep.subr.mxu0 %v1394_v12  ;;  %v1315_v25 = vand.u32 2147483647, %v1267_v53  ;;  %v1297_v56 = vand.u32 2147483647, %v1249_v13  ;;  %v943_v34 = vadd.s32 264, %v2846_v62 }
 0x20d   : > { %3505 = vst [vmem:[#allocation20_spill] sm:$0xff] %v3119_v8  ;;  %3506 = vst [vmem:[#allocation21_spill] sm:$0xff] %v3122_v16  ;;  %v1233_v33 = vsub.f32 %v3119_v8, %v2941_v54  ;;  %2211 = vmatpush3.msra.mxu0 %v1378_v11  ;;  %v1266_v57 = vsub.f32 %v3122_v16, %v2941_v54  ;;  %v1248_v38 = vsub.f32 %v3124_v23, %v2941_v54 }
 0x20e   : > { %3507 = vst [vmem:[#allocation22_spill] sm:$0xff] %v3124_v23  ;;  %v1280_v40 = vand.u32 2147483647, %v1232_v24  ;;  %v1017_v44 = vstv %s1016_s13  ;;  %v1363_v42 = vsub.f32 1.0, %v1315_v25  ;;  %v1345_v61 = vsub.f32 1.0, %v1297_v56 }
 0x20f   : > { %v1281_v12 = vand.u32 2147483647, %v1233_v33  ;;  %v3136_v53 = vcvt.s32.f32 %v943_v34  ;;  %v1314_v13 = vand.u32 2147483647, %v1266_v57  ;;  %v1296_v4 = vand.u32 2147483647, %v1248_v38 }
 0x210   : > { %v1328_v8 = vsub.f32 1.0, %v1280_v40  ;;  %v1018_v7 = vadd.f32 %v1017_v44, %v2850_v1  ;;  %v1411_v11 = vmax.f32 %v1363_v42, 0.0  ;;  %v1393_v63 = vmax.f32 %v1345_v61, 0.0 }
 0x211   : > { %3508 = vst [vmem:[#allocation23_spill] sm:$0xff] %v3136_v53  ;;  %v1329_v39 = vsub.f32 1.0, %v1281_v12  ;;  %v1265_v16 = vsub.f32 %v3136_v53, %v2941_v54  ;;  %v1362_v23 = vsub.f32 1.0, %v1314_v13  ;;  %v1344_v24 = vsub.f32 1.0, %v1296_v4  ;;  %v1424_v4 = vld [vmem:[%s2903_s20 + $0x20] sm:$0xff] }
 0x212   : > { %v1376_v25 = vmax.f32 %v1328_v8, 0.0  ;;  %v1019_v56 = vadd.f32 %v1018_v7, %v2909_v6  ;;  %2365 = vmatpush3.msra.mxu1 %v1411_v11  ;;  %2212 = vmatprep.subr.mxu0 %v1393_v63  ;;  %v1022_v57 = vsub.s32 0, %v2846_v62  ;;  %v942_v38 = vadd.s32 256, %v2846_v62  ;;  %v1221_v63 = vld [vmem:[%s2903_s20 + $0x8] sm:$0xff] }
 0x213   : > { %v1377_v33 = vmax.f32 %v1329_v39, 0.0  ;;  %v1313_v34 = vand.u32 2147483647, %v1265_v16  ;;  %v3509_v61 = vmov 0.0   ;;  %v1410_v40 = vmax.f32 %v1362_v23, 0.0 }
 0x214   : > { %2366 = vmatprep.subr.mxu1 %v3509_v61  ;;  %v1392_v44 = vmax.f32 %v1344_v24, 0.0  ;;  %v1709_v42 = vstv %s1708_s21  ;;  %v3146_v8 = vrot.slane %v1019_v56, %v1022_v57  ;;  %v3148_v6 = vcvt.s32.f32 %v942_v38  ;;  %s3533_s21 = sand.u32 1, %s2605_s28  }
 0x215   : > { %2213 = vmatpush3.msra.mxu0 %v1377_v33  ;;  %v1361_v12 = vsub.f32 1.0, %v1313_v34  ;;  %v3151_v39 = vadd.f32 %v1709_v42, %v2850_v1  ;;  %2367 = vmatpush3.msra.mxu1 %v1410_v40  ;;  %s2054_s30 = scalar_lea.sflag [#allocation5], %s3533_s21 }
 0x216   : > { %2214 = vmatprep.subr.mxu0 %v1392_v44  ;;  %2368 = vmatprep.subr.mxu1 %v3509_v61  ;;  %v1055_v23 = vsub.f32 %v2862_v14, %v3146_v8  ;;  %v1264_v13 = vsub.f32 %v3148_v6, %v2941_v54  ;;  %v1039_v11 = vsub.f32 %v2864_v15, %v3146_v8 }
 0x217   : > { %2215 = vmatpush3.msra.mxu0 %v1376_v25  ;;  %v1409_v16 = vmax.f32 %v1361_v12, 0.0  ;;  %v1054_v1 = vsub.f32 %v2868_v17, %v3146_v8  ;;  %v1038_v24 = vsub.f32 %v2870_v18, %v3146_v8  ;;  %v1071_v25 = vsub.f32 %v2872_v19, %v3146_v8 }
 0x218   : > { %1492 = vmatmul.mubr.f32.vlgmr.msra.gmra.mxu0 %v1424_v4  ;;  %v1053_v56 = vsub.f32 %v2874_v20, %v3146_v8  ;;  %v1103_v33 = vand.u32 2147483647, %v1055_v23  ;;  %v1312_v34 = vand.u32 2147483647, %v1264_v13  ;;  %v1087_v54 = vand.u32 2147483647, %v1039_v11 }
 0x219   : > { %2369 = vmatpush3.msra.mxu1 %v1409_v16  ;;  %v1037_v57 = vsub.f32 %v2878_v21, %v3146_v8  ;;  %1631 = vmatprep.mubr.f32.mxu0 %v1221_v63  ;;  %v1102_v38 = vand.u32 2147483647, %v1054_v1  ;;  %v1086_v40 = vand.u32 2147483647, %v1038_v24  ;;  %v1119_v44 = vand.u32 2147483647, %v1071_v25 }
 0x21a   : > { %2370 = vmatprep.subr.mxu1 %v3509_v61  ;;  %v1070_v42 = vsub.f32 %v2880_v22, %v3146_v8  ;;  %v1151_v12 = vsub.f32 1.0, %v1103_v33  ;;  %v1360_v4 = vsub.f32 1.0, %v1312_v34  ;;  %v1135_v7 = vsub.f32 1.0, %v1087_v54  ;;  %v1426_v1 = vld [vmem:[%s2903_s20 + $0x30] sm:$0xff] }
 0x21b   : > { %v1101_v16 = vand.u32 2147483647, %v1053_v56  ;;  %v1150_v23 = vsub.f32 1.0, %v1102_v38  ;;  %v1134_v13 = vsub.f32 1.0, %v1086_v40  ;;  %v1167_v11 = vsub.f32 1.0, %v1119_v44 }
 0x21c   : > { %v1085_v20 = vand.u32 2147483647, %v1037_v57  ;;  %v1199_v19 = vmax.f32 %v1151_v12, 0.0  ;;  %v1408_v21 = vmax.f32 %v1360_v4, 0.0  ;;  %v1183_v63 = vmax.f32 %v1135_v7, 0.0 }
 0x21d   : > { %v1149_v18 = vsub.f32 1.0, %v1101_v16  ;;  %v1198_v17 = vmax.f32 %v1150_v23, 0.0  ;;  %v1182_v24 = vmax.f32 %v1134_v13, 0.0  ;;  %v1215_v15 = vmax.f32 %v1167_v11, 0.0 }
 0x21e   : > { %v1133_v25 = vsub.f32 1.0, %v1085_v20  ;;  %2236 = vmatprep.subr.mxu0 %v1199_v19  ;;  %2371 = vmatpush3.msra.mxu1 %v1408_v21  ;;  %v1118_v33 = vand.u32 2147483647, %v1070_v42  ;;  %v1052_v56 = vsub.f32 %v2889_v31, %v3146_v8  ;;  %v1036_v34 = vsub.f32 %v2891_v32, %v3146_v8 }
 0x21f   : > { %v1197_v22 = vmax.f32 %v1149_v18, 0.0  ;;  %2237 = vmatpush3.msra.mxu0 %v1183_v63  ;;  %2375 = vmatprep.subr.mxu1 %v3509_v61  ;;  %v1069_v54 = vsub.f32 %v2895_v37, %v3146_v8  ;;  %v1051_v20 = vsub.f32 %v2897_v29, %v3146_v8  ;;  %v1035_v18 = vsub.f32 %v2899_v30, %v3146_v8 }
 0x220   : > { %v1181_v7 = vmax.f32 %v1133_v25, 0.0  ;;  %2238 = vmatprep.subr.mxu0 %v1198_v17  ;;  %2373 = vmatmul.mubr.f32.vlgmr.msra.gmra.mxu1 %v1426_v1  ;;  %v1166_v19 = vsub.f32 1.0, %v1118_v33  ;;  %v1100_v21 = vand.u32 2147483647, %v1052_v56  ;;  %v1084_v57 = vand.u32 2147483647, %v1036_v34 }
 0x221   : > { %v1068_v38 = vsub.f32 %v2901_v5, %v3146_v8  ;;  %2239 = vmatpush3.msra.mxu0 %v1182_v24  ;;  %2376 = vmatpush3.msra.mxu1 %v1215_v15  ;;  %v1117_v40 = vand.u32 2147483647, %v1069_v54  ;;  %v1099_v44 = vand.u32 2147483647, %v1051_v20  ;;  %v1083_v42 = vand.u32 2147483647, %v1035_v18 }
 0x222   : > { %v1050_v12 = vsub.f32 %v2911_v35, %v3146_v8  ;;  %2240 = vmatprep.subr.mxu0 %v1197_v22  ;;  %2377 = vmatprep.subr.mxu1 %v3509_v61  ;;  %v1214_v4 = vmax.f32 %v1166_v19, 0.0  ;;  %v1148_v17 = vsub.f32 1.0, %v1100_v21  ;;  %v1132_v16 = vsub.f32 1.0, %v1084_v57 }
 0x223   : > { %v1116_v23 = vand.u32 2147483647, %v1068_v38  ;;  %2241 = vmatpush3.msra.mxu0 %v1181_v7  ;;  %v1165_v13 = vsub.f32 1.0, %v1117_v40  ;;  %v1147_v11 = vsub.f32 1.0, %v1099_v44  ;;  %v1131_v63 = vsub.f32 1.0, %v1083_v42  ;;  %2407 = vmatprep.mubr.msk.f32.mxu1 %vm2638_vm5, %v3509_v61 }
 0x224   : > { %v1098_v1 = vand.u32 2147483647, %v1050_v12  ;;  %2378 = vmatpush3.msra.mxu1 %v1214_v4  ;;  %v1196_v15 = vmax.f32 %v1148_v17, 0.0  ;;  %v1180_v24 = vmax.f32 %v1132_v16, 0.0  ;;  %v1034_v22 = vsub.f32 %v2913_v36, %v3146_v8 }
 0x225   : > { %v1164_v25 = vsub.f32 1.0, %v1116_v23  ;;  %2379 = vmatprep.subr.mxu1 %v3509_v61  ;;  %v1213_v33 = vmax.f32 %v1165_v13, 0.0  ;;  %v1195_v56 = vmax.f32 %v1147_v11, 0.0  ;;  %v1179_v34 = vmax.f32 %v1131_v63, 0.0 }
 0x226   : > { %v1146_v7 = vsub.f32 1.0, %v1098_v1  ;;  %2242 = vmatprep.subr.mxu0 %v1196_v15  ;;  %v1082_v20 = vand.u32 2147483647, %v1034_v22  ;;  %v1067_v18 = vsub.f32 %v2920_v43, %v3146_v8  ;;  %v1049_v19 = vsub.f32 %v2926_v47, %v3146_v8 }
 0x227   : > { %v1212_v54 = vmax.f32 %v1164_v25, 0.0  ;;  %2243 = vmatpush3.msra.mxu0 %v1180_v24  ;;  %2380 = vmatpush3.msra.mxu1 %v1213_v33  ;;  %v1033_v57 = vsub.f32 %v2928_v48, %v3146_v8  ;;  %v1066_v38 = vsub.f32 %v2930_v49, %v3146_v8  ;;  %v1048_v40 = vsub.f32 %v2932_v50, %v3146_v8 }
 0x228   : > { %v1194_v21 = vmax.f32 %v1146_v7, 0.0  ;;  %2244 = vmatprep.subr.mxu0 %v1195_v56  ;;  %2381 = vmatprep.subr.mxu1 %v3509_v61  ;;  %v1130_v44 = vsub.f32 1.0, %v1082_v20  ;;  %v1115_v42 = vand.u32 2147483647, %v1067_v18  ;;  %v1097_v12 = vand.u32 2147483647, %v1049_v19 }
 0x229   : > { %v1032_v4 = vsub.f32 %v2934_v51, %v3146_v8  ;;  %2245 = vmatpush3.msra.mxu0 %v1179_v34  ;;  %2382 = vmatpush3.msra.mxu1 %v1212_v54  ;;  %v1081_v17 = vand.u32 2147483647, %v1033_v57  ;;  %v1114_v16 = vand.u32 2147483647, %v1066_v38  ;;  %v1096_v23 = vand.u32 2147483647, %v1048_v40 }
 0x22a   : > { %v1065_v13 = vsub.f32 %v2936_v52, %v3146_v8  ;;  %2246 = vmatprep.subr.mxu0 %v1194_v21  ;;  %2383 = vmatprep.subr.mxu1 %v3509_v61  ;;  %v1178_v11 = vmax.f32 %v1130_v44, 0.0  ;;  %v1163_v63 = vsub.f32 1.0, %v1115_v42  ;;  %v1145_v1 = vsub.f32 1.0, %v1097_v12 }
 0x22b   : > { %v1080_v15 = vand.u32 2147483647, %v1032_v4  ;;  %v1129_v24 = vsub.f32 1.0, %v1081_v17  ;;  %v1162_v25 = vsub.f32 1.0, %v1114_v16  ;;  %v1144_v22 = vsub.f32 1.0, %v1096_v23 }
 0x22c   : > { %v1113_v33 = vand.u32 2147483647, %v1065_v13  ;;  %2247 = vmatpush3.msra.mxu0 %v1178_v11  ;;  %v1211_v56 = vmax.f32 %v1163_v63, 0.0  ;;  %v1193_v34 = vmax.f32 %v1145_v1, 0.0  ;;  %v1047_v54 = vsub.f32 %v2952_v58, %v3146_v8 }
 0x22d   : > { %v1128_v7 = vsub.f32 1.0, %v1080_v15  ;;  %v1177_v20 = vmax.f32 %v1129_v24, 0.0  ;;  %v1210_v18 = vmax.f32 %v1162_v25, 0.0  ;;  %v1192_v19 = vmax.f32 %v1144_v22, 0.0 }
 0x22e   : > { %v1161_v21 = vsub.f32 1.0, %v1113_v33  ;;  %2384 = vmatpush3.msra.mxu1 %v1211_v56  ;;  %2248 = vmatprep.subr.mxu0 %v1193_v34  ;;  %v1095_v38 = vand.u32 2147483647, %v1047_v54  ;;  %v1031_v40 = vsub.f32 %v3016_v9, %v3146_v8  ;;  %v1064_v44 = vsub.f32 %v3019_v10, %v3146_v8 }
 0x22f   : > { %v1176_v57 = vmax.f32 %v1128_v7, 0.0  ;;  %2385 = vmatprep.subr.mxu1 %v3509_v61  ;;  %2249 = vmatpush3.msra.mxu0 %v1177_v20  ;;  %v1046_v12 = vsub.f32 %v3027_v55, %v3146_v8  ;;  %v1030_v4 = vsub.f32 %v3030_v26, %v3146_v8  ;;  %v1063_v17 = vsub.f32 %v3033_v27, %v3146_v8 }
 0x230   : > { %v1209_v42 = vmax.f32 %v1161_v21, 0.0  ;;  %2386 = vmatpush3.msra.mxu1 %v1210_v18  ;;  %2250 = vmatprep.subr.mxu0 %v1192_v19  ;;  %v1143_v16 = vsub.f32 1.0, %v1095_v38  ;;  %v1079_v23 = vand.u32 2147483647, %v1031_v40  ;;  %v1112_v13 = vand.u32 2147483647, %v1064_v44 }
 0x231   : > { %v1045_v11 = vsub.f32 %v3036_v28, %v3146_v8  ;;  %2387 = vmatprep.subr.mxu1 %v3509_v61  ;;  %2251 = vmatpush3.msra.mxu0 %v1176_v57  ;;  %v1094_v63 = vand.u32 2147483647, %v1046_v12  ;;  %v1078_v1 = vand.u32 2147483647, %v1030_v4  ;;  %v1111_v15 = vand.u32 2147483647, %v1063_v17 }
 0x232   : > { %v1029_v24 = vsub.f32 %v3050_v41, %v3146_v8  ;;  %2388 = vmatpush3.msra.mxu1 %v1209_v42  ;;  %v1191_v25 = vmax.f32 %v1143_v16, 0.0  ;;  %v1127_v22 = vsub.f32 1.0, %v1079_v23  ;;  %v1160_v33 = vsub.f32 1.0, %v1112_v13 }
 0x233   : > { %v1093_v56 = vand.u32 2147483647, %v1045_v11  ;;  %2389 = vmatprep.subr.mxu1 %v3509_v61  ;;  %v1142_v34 = vsub.f32 1.0, %v1094_v63  ;;  %v1126_v7 = vsub.f32 1.0, %v1078_v1  ;;  %v1159_v54 = vsub.f32 1.0, %v1111_v15 }
 0x234   : > { %v1077_v20 = vand.u32 2147483647, %v1029_v24  ;;  %2252 = vmatprep.subr.mxu0 %v1191_v25  ;;  %v1175_v18 = vmax.f32 %v1127_v22, 0.0  ;;  %v1208_v19 = vmax.f32 %v1160_v33, 0.0  ;;  %v1062_v57 = vsub.f32 %v3052_v45, %v3146_v8  ;;  %v3510_v25 = vld [vmem:[#allocation15_spill] sm:$0xff] }
 0x235   : > { %v1141_v21 = vsub.f32 1.0, %v1093_v56  ;;  %v1190_v38 = vmax.f32 %v1142_v34, 0.0  ;;  %v1174_v40 = vmax.f32 %v1126_v7, 0.0  ;;  %v1207_v44 = vmax.f32 %v1159_v54, 0.0 }
 0x236   : > { %v1125_v42 = vsub.f32 1.0, %v1077_v20  ;;  %2253 = vmatpush3.msra.mxu0 %v1175_v18  ;;  %2390 = vmatpush3.msra.mxu1 %v1208_v19  ;;  %v1110_v4 = vand.u32 2147483647, %v1062_v57  ;;  %v1044_v17 = vsub.f32 %v3061_v59, %v3146_v8  ;;  %v1028_v16 = vsub.f32 %v3063_v60, %v3146_v8 }
 0x237   : > { %v1189_v12 = vmax.f32 %v1141_v21, 0.0  ;;  %2254 = vmatprep.subr.mxu0 %v1190_v38  ;;  %2391 = vmatprep.subr.mxu1 %v3509_v61  ;;  %v1061_v13 = vsub.f32 %v3074_v46, %v3146_v8  ;;  %v1043_v11 = vsub.f32 %v3076_v0, %v3146_v8  ;;  %v1027_v63 = vsub.f32 %v3078_v2, %v3146_v8 }
 0x238   : > { %v1173_v23 = vmax.f32 %v1125_v42, 0.0  ;;  %2255 = vmatpush3.msra.mxu0 %v1174_v40  ;;  %2392 = vmatpush3.msra.mxu1 %v1207_v44  ;;  %v1158_v1 = vsub.f32 1.0, %v1110_v4  ;;  %v1092_v15 = vand.u32 2147483647, %v1044_v17  ;;  %v1076_v24 = vand.u32 2147483647, %v1028_v16 }
 0x239   : > { %v1060_v22 = vsub.f32 %v3510_v25, %v3146_v8  ;;  %2256 = vmatprep.subr.mxu0 %v1189_v12  ;;  %2393 = vmatprep.subr.mxu1 %v3509_v61  ;;  %v1109_v33 = vand.u32 2147483647, %v1061_v13  ;;  %v1091_v56 = vand.u32 2147483647, %v1043_v11  ;;  %v1075_v34 = vand.u32 2147483647, %v1027_v63 }
 0x23a   : > { %v1042_v7 = vsub.f32 %v3093_v3, %v3146_v8  ;;  %2257 = vmatpush3.msra.mxu0 %v1173_v23  ;;  %v1206_v54 = vmax.f32 %v1158_v1, 0.0  ;;  %v1140_v20 = vsub.f32 1.0, %v1092_v15  ;;  %v1124_v18 = vsub.f32 1.0, %v1076_v24  ;;  %v3511_v4 = vld [vmem:[#allocation16_spill] sm:$0xff]  ;;  %v3512_v15 = vld [vmem:[#allocation17_spill] sm:$0xff] }
 0x23b   : > { %v1108_v19 = vand.u32 2147483647, %v1060_v22  ;;  %v1157_v21 = vsub.f32 1.0, %v1109_v33  ;;  %v1139_v57 = vsub.f32 1.0, %v1091_v56  ;;  %v1123_v38 = vsub.f32 1.0, %v1075_v34  ;;  %v3513_v22 = vld [vmem:[#allocation18_spill] sm:$0xff] }
 0x23c   : > { %v1090_v40 = vand.u32 2147483647, %v1042_v7  ;;  %2394 = vmatpush3.msra.mxu1 %v1206_v54  ;;  %v1188_v44 = vmax.f32 %v1140_v20, 0.0  ;;  %v1172_v42 = vmax.f32 %v1124_v18, 0.0  ;;  %v1026_v17 = vsub.f32 %v3511_v4, %v3146_v8  ;;  %v3514_v34 = vld [vmem:[#allocation20_spill] sm:$0xff]  ;;  %v3515_v54 = vld [vmem:[#allocation21_spill] sm:$0xff] }
 0x23d   : > { %v1156_v12 = vsub.f32 1.0, %v1108_v19  ;;  %2395 = vmatprep.subr.mxu1 %v3509_v61  ;;  %v1205_v16 = vmax.f32 %v1157_v21, 0.0  ;;  %v1187_v13 = vmax.f32 %v1139_v57, 0.0  ;;  %v1171_v23 = vmax.f32 %v1123_v38, 0.0  ;;  %v3516_v18 = vld [vmem:[#allocation22_spill] sm:$0xff] }
 0x23e   : > { %v1138_v11 = vsub.f32 1.0, %v1090_v40  ;;  %2258 = vmatprep.subr.mxu0 %v1188_v44  ;;  %v1074_v1 = vand.u32 2147483647, %v1026_v17  ;;  %v1059_v24 = vsub.f32 %v3512_v15, %v3146_v8  ;;  %v1041_v33 = vsub.f32 %v3513_v22, %v3146_v8  ;;  %v3517_v40 = vld [vmem:[#allocation19_spill] sm:$0xff] }
 0x23f   : > { %v1204_v63 = vmax.f32 %v1156_v12, 0.0  ;;  %2259 = vmatpush3.msra.mxu0 %v1172_v42  ;;  %2396 = vmatpush3.msra.mxu1 %v1205_v16  ;;  %v1025_v7 = vsub.f32 %v3514_v34, %v3146_v8  ;;  %v1058_v20 = vsub.f32 %v3515_v54, %v3146_v8  ;;  %v1040_v19 = vsub.f32 %v3516_v18, %v3146_v8 }
 0x240   : > { %v1186_v56 = vmax.f32 %v1138_v11, 0.0  ;;  %2260 = vmatprep.subr.mxu0 %v1187_v13  ;;  %2397 = vmatprep.subr.mxu1 %v3509_v61  ;;  %v1122_v21 = vsub.f32 1.0, %v1074_v1  ;;  %v1107_v57 = vand.u32 2147483647, %v1059_v24  ;;  %v1089_v38 = vand.u32 2147483647, %v1041_v33 }
 0x241   : > { %v1024_v44 = vsub.f32 %v3517_v40, %v3146_v8  ;;  %2261 = vmatpush3.msra.mxu0 %v1171_v23  ;;  %2398 = vmatpush3.msra.mxu1 %v1204_v63  ;;  %v1073_v42 = vand.u32 2147483647, %v1025_v7  ;;  %v1106_v12 = vand.u32 2147483647, %v1058_v20  ;;  %v1088_v17 = vand.u32 2147483647, %v1040_v19 }
 0x242   : > { %v1057_v16 = vsub.f32 %v3136_v53, %v3146_v8  ;;  %2262 = vmatprep.subr.mxu0 %v1186_v56  ;;  %2399 = vmatprep.subr.mxu1 %v3509_v61  ;;  %v1170_v13 = vmax.f32 %v1122_v21, 0.0  ;;  %v1155_v11 = vsub.f32 1.0, %v1107_v57  ;;  %v1137_v1 = vsub.f32 1.0, %v1089_v38  ;;  %v2536_v20 = vld [vmem:[%s1014_s26] sm:$0x7] }
 0x243   : > { %v1072_v24 = vand.u32 2147483647, %v1024_v44  ;;  %v1121_v33 = vsub.f32 1.0, %v1073_v42  ;;  %v1154_v18 = vsub.f32 1.0, %v1106_v12  ;;  %v1136_v54 = vsub.f32 1.0, %v1088_v17 }
 0x244   : > { %v1105_v40 = vand.u32 2147483647, %v1057_v16  ;;  %2263 = vmatpush3.msra.mxu0 %v1170_v13  ;;  %v1203_v23 = vmax.f32 %v1155_v11, 0.0  ;;  %v1185_v63 = vmax.f32 %v1137_v1, 0.0  ;;  %v1711_v19 = vadd.f32 %v2536_v20, %v3151_v39  ;;  %v1220_v39 = vld [vmem:[%s2903_s20] sm:$0xff]  ;;  %v1909_v13 = vld [vmem:[%s2903_s20 + $0x48] sm:$0xff] }
 0x245   : > { %v1120_v7 = vsub.f32 1.0, %v1072_v24  ;;  %v1169_v56 = vmax.f32 %v1121_v33, 0.0  ;;  %v1202_v53 = vmax.f32 %v1154_v18, 0.0  ;;  %v1184_v34 = vmax.f32 %v1136_v54, 0.0  ;;  %v3523_v1 = vld [vmem:[#allocation12_spill] sm:$0xff] }
 0x246   : > { %v1153_v21 = vsub.f32 1.0, %v1105_v40  ;;  %2400 = vmatpush3.msra.mxu1 %v1203_v23  ;;  %2264 = vmatprep.subr.mxu0 %v1185_v63  ;;  %v3518_v38 = vsub.s32 2, %v2846_v62  ;;  %v1056_v42 = vsub.f32 %v3148_v6, %v3146_v8  ;;  %v3519_v40 = vld [vmem:[#allocation8_spill] sm:$0xff]  ;;  %v3520_v62 = vld [vmem:[#allocation9_spill] sm:$0xff]  ;;  %v3521_v8 = vld [vmem:[#allocation10_spill] sm:$0xff] }
 0x247   : > { %v1168_v57 = vmax.f32 %v1120_v7, 0.0  ;;  %2401 = vmatprep.subr.mxu1 %v3509_v61  ;;  %2265 = vmatpush3.msra.mxu0 %v1169_v56  ;;  %v3524_v63 = vld [vmem:[#allocation13_spill] sm:$0xff] }
 0x248   : > { %v3274_v44 = vrot.slane %v1711_v19, %v3518_v38  ;;  %v1201_v12 = vmax.f32 %v1153_v21, 0.0  ;;  %2402 = vmatpush3.msra.mxu1 %v1202_v53  ;;  %2266 = vmatprep.subr.mxu0 %v1184_v34  ;;  %v1104_v18 = vand.u32 2147483647, %v1056_v42  ;;  %v3522_v53 = vld [vmem:[#allocation11_spill] sm:$0xff]  ;;  %v3525_v21 = vld [vmem:[#allocation14_spill] sm:$0xff] }
 0x249   : > { %2403 = vmatprep.subr.mxu1 %v3509_v61  ;;  %2267 = vmatpush3.msra.mxu0 %v1168_v57 }
 0x24a   : > { %v1747_v54 = vsub.f32 %v2862_v14, %v3274_v44  ;;  %v1731_v17 = vsub.f32 %v3519_v40, %v3274_v44  ;;  %v1746_v16 = vsub.f32 %v3520_v62, %v3274_v44  ;;  %v1730_v11 = vsub.f32 %v3521_v8, %v3274_v44  ;;  %2404 = vmatpush3.msra.mxu1 %v1201_v12  ;;  %v1222_v12 = vld [vmem:[%s2903_s20 + $0x10] sm:$0xff] }
 0x24b   : > { %v1763_v34 = vsub.f32 %v3522_v53, %v3274_v44  ;;  %v1745_v14 = vsub.f32 %v3523_v1, %v3274_v44  ;;  %1632 = vmatmul.mubr.f32.vlgmr.msra.gmra.mxu0 %v1220_v39  ;;  %v1152_v33 = vsub.f32 1.0, %v1104_v18  ;;  %v1729_v7 = vsub.f32 %v3524_v63, %v3274_v44  ;;  %2405 = vmatprep.subr.mxu1 %v3509_v61 }
 0x24c   : > { %v1795_v24 = vand.u32 2147483647, %v1747_v54  ;;  %v1779_v23 = vand.u32 2147483647, %v1731_v17  ;;  %v1794_v20 = vand.u32 2147483647, %v1746_v16  ;;  %v1762_v57 = vsub.f32 %v3525_v21, %v3274_v44  ;;  %1975 = vmatprep.mubr.f32.mxu0 %v1909_v13 }
 0x24d   : > { %v1778_v19 = vand.u32 2147483647, %v1730_v11  ;;  %v1811_v56 = vand.u32 2147483647, %v1763_v34  ;;  %v1200_v42 = vmax.f32 %v1152_v33, 0.0  ;;  %v1728_v63 = vsub.f32 %v2891_v32, %v3274_v44 }
 0x24e   : > { %v1843_v38 = vsub.f32 1.0, %v1795_v24  ;;  %v1827_v40 = vsub.f32 1.0, %v1779_v23  ;;  %v1793_v39 = vand.u32 2147483647, %v1745_v14  ;;  %v1842_v54 = vsub.f32 1.0, %v1794_v20 }
 0x24f   : > { %v1826_v18 = vsub.f32 1.0, %v1778_v19  ;;  %v1859_v17 = vsub.f32 1.0, %v1811_v56  ;;  %v1777_v62 = vand.u32 2147483647, %v1729_v7  ;;  %2406 = vmatpush3.msra.mxu1 %v1200_v42  ;;  %v1810_v16 = vand.u32 2147483647, %v1762_v57 }
 0x250   : > { %v1891_v8 = vmax.f32 %v1843_v38, 0.0  ;;  %v1875_v53 = vmax.f32 %v1827_v40, 0.0  ;;  %v1841_v1 = vsub.f32 1.0, %v1793_v39  ;;  %v1890_v11 = vmax.f32 %v1842_v54, 0.0  ;;  %2410 = vmatprep.subr.mxu1 %v3509_v61  ;;  %2408 = vmatmul.mubr.f32.vlgmr.msra.gmra.mxu1 %v1222_v12 }
 0x251   : > { %v1874_v34 = vmax.f32 %v1826_v18, 0.0  ;;  %v1907_v13 = vmax.f32 %v1859_v17, 0.0  ;;  %v1825_v24 = vsub.f32 1.0, %v1777_v62  ;;  %v1858_v23 = vsub.f32 1.0, %v1810_v16  ;;  %2442 = vmatprep.mubr.msk.f32.mxu1 %vm2638_vm5, %v3509_v61 }
 0x252   : > { %2288 = vmatprep.subr.mxu0 %v1891_v8  ;;  %v1889_v33 = vmax.f32 %v1841_v1, 0.0  ;;  %v1744_v14 = vsub.f32 %v2889_v31, %v3274_v44  ;;  %v1761_v20 = vsub.f32 %v2895_v37, %v3274_v44  ;;  %v1743_v19 = vsub.f32 %v2897_v29, %v3274_v44 }
 0x253   : > { %2289 = vmatpush3.msra.mxu0 %v1875_v53  ;;  %2411 = vmatpush3.msra.mxu1 %v1907_v13  ;;  %v1873_v7 = vmax.f32 %v1825_v24, 0.0  ;;  %v1727_v56 = vsub.f32 %v2899_v30, %v3274_v44  ;;  %v1906_v31 = vmax.f32 %v1858_v23, 0.0  ;;  %v1776_v21 = vand.u32 2147483647, %v1728_v63 }
 0x254   : > { %2290 = vmatprep.subr.mxu0 %v1890_v11  ;;  %2412 = vmatprep.subr.mxu1 %v3509_v61  ;;  %v1792_v32 = vand.u32 2147483647, %v1744_v14  ;;  %v1760_v57 = vsub.f32 %v2901_v5, %v3274_v44  ;;  %v1809_v38 = vand.u32 2147483647, %v1761_v20  ;;  %v1791_v42 = vand.u32 2147483647, %v1743_v19 }
 0x255   : > { %2291 = vmatpush3.msra.mxu0 %v1874_v34  ;;  %v1775_v40 = vand.u32 2147483647, %v1727_v56  ;;  %v1742_v37 = vsub.f32 %v2911_v35, %v3274_v44  ;;  %2413 = vmatpush3.msra.mxu1 %v1906_v31  ;;  %v1824_v30 = vsub.f32 1.0, %v1776_v21  ;;  %v1726_v39 = vsub.f32 %v2913_v36, %v3274_v44 }
 0x256   : > { %2292 = vmatprep.subr.mxu0 %v1889_v33  ;;  %v1840_v29 = vsub.f32 1.0, %v1792_v32  ;;  %v1808_v12 = vand.u32 2147483647, %v1760_v57  ;;  %2414 = vmatprep.subr.mxu1 %v3509_v61  ;;  %v1857_v54 = vsub.f32 1.0, %v1809_v38  ;;  %v1839_v5 = vsub.f32 1.0, %v1791_v42 }
 0x257   : > { %2293 = vmatpush3.msra.mxu0 %v1873_v7  ;;  %v1823_v18 = vsub.f32 1.0, %v1775_v40  ;;  %v1790_v17 = vand.u32 2147483647, %v1742_v37  ;;  %v1872_v8 = vmax.f32 %v1824_v30, 0.0  ;;  %v1774_v1 = vand.u32 2147483647, %v1726_v39 }
 0x258   : > { %v1888_v62 = vmax.f32 %v1840_v29, 0.0  ;;  %v1856_v53 = vsub.f32 1.0, %v1808_v12  ;;  %v1905_v35 = vmax.f32 %v1857_v54, 0.0  ;;  %v1887_v16 = vmax.f32 %v1839_v5, 0.0 }
 0x259   : > { %v1871_v11 = vmax.f32 %v1823_v18, 0.0  ;;  %v1838_v34 = vsub.f32 1.0, %v1790_v17  ;;  %v1822_v24 = vsub.f32 1.0, %v1774_v1  ;;  %v1759_v36 = vsub.f32 %v2920_v43, %v3274_v44 }
 0x25a   : > { %2294 = vmatprep.subr.mxu0 %v1888_v62  ;;  %v1904_v13 = vmax.f32 %v1856_v53, 0.0  ;;  %v1741_v33 = vsub.f32 %v2926_v47, %v3274_v44  ;;  %2415 = vmatpush3.msra.mxu1 %v1905_v35  ;;  %v1725_v14 = vsub.f32 %v2928_v48, %v3274_v44  ;;  %v1758_v63 = vsub.f32 %v2930_v49, %v3274_v44 }
 0x25b   : > { %2295 = vmatpush3.msra.mxu0 %v1872_v8  ;;  %v1886_v23 = vmax.f32 %v1838_v34, 0.0  ;;  %v1740_v7 = vsub.f32 %v2932_v50, %v3274_v44  ;;  %2416 = vmatprep.subr.mxu1 %v3509_v61  ;;  %v1870_v20 = vmax.f32 %v1822_v24, 0.0  ;;  %v1807_v43 = vand.u32 2147483647, %v1759_v36 }
 0x25c   : > { %2296 = vmatprep.subr.mxu0 %v1887_v16  ;;  %v1789_v19 = vand.u32 2147483647, %v1741_v33  ;;  %v1724_v47 = vsub.f32 %v2934_v51, %v3274_v44  ;;  %2417 = vmatpush3.msra.mxu1 %v1904_v13  ;;  %v1773_v56 = vand.u32 2147483647, %v1725_v14  ;;  %v1806_v31 = vand.u32 2147483647, %v1758_v63 }
 0x25d   : > { %2297 = vmatpush3.msra.mxu0 %v1871_v11  ;;  %v1788_v48 = vand.u32 2147483647, %v1740_v7  ;;  %v1757_v49 = vsub.f32 %v2936_v52, %v3274_v44  ;;  %2418 = vmatprep.subr.mxu1 %v3509_v61  ;;  %v1855_v50 = vsub.f32 1.0, %v1807_v43  ;;  %v1739_v57 = vsub.f32 %v2952_v58, %v3274_v44 }
 0x25e   : > { %2298 = vmatprep.subr.mxu0 %v1886_v23  ;;  %v1837_v32 = vsub.f32 1.0, %v1789_v19  ;;  %v1772_v21 = vand.u32 2147483647, %v1724_v47  ;;  %v1821_v38 = vsub.f32 1.0, %v1773_v56  ;;  %v1854_v51 = vsub.f32 1.0, %v1806_v31 }
 0x25f   : > { %2299 = vmatpush3.msra.mxu0 %v1870_v20  ;;  %v1836_v42 = vsub.f32 1.0, %v1788_v48  ;;  %v1805_v40 = vand.u32 2147483647, %v1757_v49  ;;  %v1903_v37 = vmax.f32 %v1855_v50, 0.0  ;;  %v1787_v12 = vand.u32 2147483647, %v1739_v57 }
 0x260   : > { %v1885_v29 = vmax.f32 %v1837_v32, 0.0  ;;  %v1820_v30 = vsub.f32 1.0, %v1772_v21  ;;  %v1869_v39 = vmax.f32 %v1821_v38, 0.0  ;;  %v1902_v52 = vmax.f32 %v1854_v51, 0.0 }
 0x261   : > { %v1884_v54 = vmax.f32 %v1836_v42, 0.0  ;;  %v1853_v5 = vsub.f32 1.0, %v1805_v40  ;;  %2419 = vmatpush3.msra.mxu1 %v1903_v37  ;;  %v1835_v17 = vsub.f32 1.0, %v1787_v12  ;;  %v1723_v58 = vsub.f32 %v3016_v9, %v3274_v44 }
 0x262   : > { %2300 = vmatprep.subr.mxu0 %v1885_v29  ;;  %v1868_v18 = vmax.f32 %v1820_v30, 0.0  ;;  %v1756_v62 = vsub.f32 %v3019_v10, %v3274_v44  ;;  %2420 = vmatprep.subr.mxu1 %v3509_v61  ;;  %v1738_v53 = vsub.f32 %v3027_v55, %v3274_v44  ;;  %v1722_v1 = vsub.f32 %v3030_v26, %v3274_v44 }
 0x263   : > { %2301 = vmatpush3.msra.mxu0 %v1869_v39  ;;  %v1901_v8 = vmax.f32 %v1853_v5, 0.0  ;;  %v1755_v35 = vsub.f32 %v3033_v27, %v3274_v44  ;;  %2421 = vmatpush3.msra.mxu1 %v1902_v52  ;;  %v1883_v16 = vmax.f32 %v1835_v17, 0.0  ;;  %v1771_v9 = vand.u32 2147483647, %v1723_v58 }
 0x264   : > { %2302 = vmatprep.subr.mxu0 %v1884_v54  ;;  %v1804_v11 = vand.u32 2147483647, %v1756_v62  ;;  %v1737_v10 = vsub.f32 %v3036_v28, %v3274_v44  ;;  %2422 = vmatprep.subr.mxu1 %v3509_v61  ;;  %v1786_v34 = vand.u32 2147483647, %v1738_v53  ;;  %v1770_v13 = vand.u32 2147483647, %v1722_v1 }
 0x265   : > { %2303 = vmatpush3.msra.mxu0 %v1868_v18  ;;  %v1803_v55 = vand.u32 2147483647, %v1755_v35  ;;  %v1721_v26 = vsub.f32 %v3050_v41, %v3274_v44  ;;  %2423 = vmatpush3.msra.mxu1 %v1901_v8  ;;  %v1819_v27 = vsub.f32 1.0, %v1771_v9  ;;  %v1754_v33 = vsub.f32 %v3052_v45, %v3274_v44 }
 0x266   : > { %2304 = vmatprep.subr.mxu0 %v1883_v16  ;;  %v1852_v24 = vsub.f32 1.0, %v1804_v11  ;;  %v1785_v36 = vand.u32 2147483647, %v1737_v10  ;;  %2424 = vmatprep.subr.mxu1 %v3509_v61  ;;  %v1834_v28 = vsub.f32 1.0, %v1786_v34  ;;  %v1818_v23 = vsub.f32 1.0, %v1770_v13  ;;  %v3526_v11 = vld [vmem:[#allocation20_spill] sm:$0xff] }
 0x267   : > { %v1851_v14 = vsub.f32 1.0, %v1803_v55  ;;  %v1769_v63 = vand.u32 2147483647, %v1721_v26  ;;  %v1867_v7 = vmax.f32 %v1819_v27, 0.0  ;;  %v1802_v19 = vand.u32 2147483647, %v1754_v33 }
 0x268   : > { %v1900_v20 = vmax.f32 %v1852_v24, 0.0  ;;  %v1833_v43 = vsub.f32 1.0, %v1785_v36  ;;  %v1882_v47 = vmax.f32 %v1834_v28, 0.0  ;;  %v1866_v41 = vmax.f32 %v1818_v23, 0.0  ;;  %v3527_v34 = vld [vmem:[#allocation21_spill] sm:$0xff]  ;;  %v3528_v55 = vld [vmem:[#allocation22_spill] sm:$0xff] }
 0x269   : > { %v1899_v56 = vmax.f32 %v1851_v14, 0.0  ;;  %v1817_v31 = vsub.f32 1.0, %v1769_v63  ;;  %2305 = vmatpush3.msra.mxu0 %v1867_v7  ;;  %v1850_v49 = vsub.f32 1.0, %v1802_v19  ;;  %v1736_v45 = vsub.f32 %v3061_v59, %v3274_v44  ;;  %v3530_v14 = vld [vmem:[#allocation23_spill] sm:$0xff] }
 0x26a   : > { %2425 = vmatpush3.msra.mxu1 %v1900_v20  ;;  %v1881_v48 = vmax.f32 %v1833_v43, 0.0  ;;  %v1720_v50 = vsub.f32 %v3063_v60, %v3274_v44  ;;  %2306 = vmatprep.subr.mxu0 %v1882_v47  ;;  %v1753_v21 = vsub.f32 %v3074_v46, %v3274_v44  ;;  %v1735_v57 = vsub.f32 %v3076_v0, %v3274_v44 }
 0x26b   : > { %2426 = vmatprep.subr.mxu1 %v3509_v61  ;;  %v1865_v32 = vmax.f32 %v1817_v31, 0.0  ;;  %v1719_v38 = vsub.f32 %v3078_v2, %v3274_v44  ;;  %2307 = vmatpush3.msra.mxu0 %v1866_v41  ;;  %v1898_v51 = vmax.f32 %v1850_v49, 0.0  ;;  %v1784_v59 = vand.u32 2147483647, %v1736_v45 }
 0x26c   : > { %2427 = vmatpush3.msra.mxu1 %v1899_v56  ;;  %v1768_v42 = vand.u32 2147483647, %v1720_v50  ;;  %v1752_v60 = vsub.f32 %v3510_v25, %v3274_v44  ;;  %2308 = vmatprep.subr.mxu0 %v1881_v48  ;;  %v1801_v40 = vand.u32 2147483647, %v1753_v21  ;;  %v1783_v37 = vand.u32 2147483647, %v1735_v57 }
 0x26d   : > { %2428 = vmatprep.subr.mxu1 %v3509_v61  ;;  %v1767_v46 = vand.u32 2147483647, %v1719_v38  ;;  %v1734_v0 = vsub.f32 %v3093_v3, %v3274_v44  ;;  %2309 = vmatpush3.msra.mxu0 %v1865_v32  ;;  %v1832_v2 = vsub.f32 1.0, %v1784_v59  ;;  %v1718_v12 = vsub.f32 %v3511_v4, %v3274_v44 }
 0x26e   : > { %2429 = vmatpush3.msra.mxu1 %v1898_v51  ;;  %v1816_v29 = vsub.f32 1.0, %v1768_v42  ;;  %v1800_v30 = vand.u32 2147483647, %v1752_v60  ;;  %v1849_v25 = vsub.f32 1.0, %v1801_v40  ;;  %v1831_v39 = vsub.f32 1.0, %v1783_v37  ;;  %v1910_v60 = vld [vmem:[%s2903_s20 + $0x50] sm:$0xff] }
 0x26f   : > { %2430 = vmatprep.subr.mxu1 %v3509_v61  ;;  %v1815_v52 = vsub.f32 1.0, %v1767_v46  ;;  %v1782_v54 = vand.u32 2147483647, %v1734_v0  ;;  %v1880_v5 = vmax.f32 %v1832_v2, 0.0  ;;  %v1766_v58 = vand.u32 2147483647, %v1718_v12 }
 0x270   : > { %v1864_v18 = vmax.f32 %v1816_v29, 0.0  ;;  %v1848_v17 = vsub.f32 1.0, %v1800_v30  ;;  %v1897_v62 = vmax.f32 %v1849_v25, 0.0  ;;  %v1879_v3 = vmax.f32 %v1831_v39, 0.0 }
 0x271   : > { %v1863_v8 = vmax.f32 %v1815_v52, 0.0  ;;  %v1830_v53 = vsub.f32 1.0, %v1782_v54  ;;  %2310 = vmatprep.subr.mxu0 %v1880_v5  ;;  %v1814_v35 = vsub.f32 1.0, %v1766_v58  ;;  %v1751_v4 = vsub.f32 %v3512_v15, %v3274_v44 }
 0x272   : > { %v1896_v1 = vmax.f32 %v1848_v17, 0.0  ;;  %v1733_v16 = vsub.f32 %v3513_v22, %v3274_v44  ;;  %2311 = vmatpush3.msra.mxu0 %v1864_v18  ;;  %2431 = vmatpush3.msra.mxu1 %v1897_v62  ;;  %v1717_v10 = vsub.f32 %v3526_v11, %v3274_v44  ;;  %v1750_v13 = vsub.f32 %v3527_v34, %v3274_v44  ;;  %v3529_v22 = vld [vmem:[#allocation19_spill] sm:$0xff] }
 0x273   : > { %v1878_v9 = vmax.f32 %v1830_v53, 0.0  ;;  %v1732_v26 = vsub.f32 %v3528_v55, %v3274_v44  ;;  %2312 = vmatprep.subr.mxu0 %v1879_v3  ;;  %2432 = vmatprep.subr.mxu1 %v3509_v61  ;;  %v1862_v27 = vmax.f32 %v1814_v35, 0.0  ;;  %v1799_v15 = vand.u32 2147483647, %v1751_v4 }
 0x274   : > { %v1781_v24 = vand.u32 2147483647, %v1733_v16  ;;  %v1716_v36 = vsub.f32 %v3529_v22, %v3274_v44  ;;  %2313 = vmatpush3.msra.mxu0 %v1863_v8  ;;  %2433 = vmatpush3.msra.mxu1 %v1896_v1  ;;  %v1765_v33 = vand.u32 2147483647, %v1717_v10  ;;  %v1798_v28 = vand.u32 2147483647, %v1750_v13 }
 0x275   : > { %v1780_v23 = vand.u32 2147483647, %v1732_v26  ;;  %v1749_v63 = vsub.f32 %v3530_v14, %v3274_v44  ;;  %2314 = vmatprep.subr.mxu0 %v1878_v9  ;;  %2434 = vmatprep.subr.mxu1 %v3509_v61  ;;  %v1847_v7 = vsub.f32 1.0, %v1799_v15  ;;  %v1748_v19 = vsub.f32 %v3148_v6, %v3274_v44  ;;  %v1908_v44 = vld [vmem:[%s2903_s20 + $0x40] sm:$0xff]  ;;  %s2069_s20 = sshll.u32 %s3531_s24, 4  ;;  %s2541_s24 = sshll.u32 %s2639_s17, 4  ;;  %s2070_s20 = int_to_ptr.vmem [resolvable:$true] %s2069_s20  ;;  %s2542_s24 = int_to_ptr.vmem [resolvable:$false] %s2541_s24 }
 0x276   : > { %v1829_v20 = vsub.f32 1.0, %v1781_v24  ;;  %v1764_v43 = vand.u32 2147483647, %v1716_v36  ;;  %2315 = vmatpush3.msra.mxu0 %v1862_v27  ;;  %v1813_v47 = vsub.f32 1.0, %v1765_v33  ;;  %v1846_v41 = vsub.f32 1.0, %v1798_v28  ;;  %s2537_s14 = scalar_lea.vmem %s2070_s20, 128  ;;  %p2544_p6 = scmp.lt.s32.totalorder %s2070_s20, %s2542_s24 }
 0x277   : > { %v1828_v56 = vsub.f32 1.0, %v1780_v23  ;;  %v1797_v31 = vand.u32 2147483647, %v1749_v63  ;;  %v1895_v48 = vmax.f32 %v1847_v7, 0.0  ;;  %v1796_v50 = vand.u32 2147483647, %v1748_v19  ;;  %p2538_p2 = scmp.ne.s32.totalorder %s2070_s20, %s2537_s14 }
 0x278   : > { %v1877_v49 = vmax.f32 %v1829_v20, 0.0  ;;  %v1812_v45 = vsub.f32 1.0, %v1764_v43  ;;  %v1861_v32 = vmax.f32 %v1813_v47, 0.0  ;;  %v1894_v21 = vmax.f32 %v1846_v41, 0.0  ;;  %s2543_s0 = scalar_lea.vmem %s2542_s24, 256 }
 0x279   : > { %v1876_v57 = vmax.f32 %v1828_v56, 0.0  ;;  %v1845_v38 = vsub.f32 1.0, %v1797_v31  ;;  %2435 = vmatpush3.msra.mxu1 %v1895_v48  ;;  %v1844_v59 = vsub.f32 1.0, %v1796_v50  ;;  %p2539_p4 = pnand %p2538_p2, %p2736_p3  ;;  %p2545_p7 = scmp.lt.s32.totalorder %s2543_s0, %s2537_s14 }
 0x27a   : > { %2316 = vmatprep.subr.mxu0 %v1877_v49  ;;  %v1860_v51 = vmax.f32 %v1812_v45, 0.0  ;;  %2436 = vmatprep.subr.mxu1 %v3509_v61 }
 0x27b   : > { %2317 = vmatpush3.msra.mxu0 %v1861_v32  ;;  %v1893_v6 = vmax.f32 %v1845_v38, 0.0  ;;  %2437 = vmatpush3.msra.mxu1 %v1894_v21  ;;  %v1892_v42 = vmax.f32 %v1844_v59, 0.0  ;;  %p2540_p5 = pneg %p2539_p4  ;;  %p2546_p9 = por %p2545_p7, %p2544_p6 }
 0x27c   : > { %2318 = vmatprep.subr.mxu0 %v1876_v57  ;;  %2438 = vmatprep.subr.mxu1 %v3509_v61 }
 0x27d   : > { %2319 = vmatpush3.msra.mxu0 %v1860_v51  ;;  %2439 = vmatpush3.msra.mxu1 %v1893_v6  ;;  %p2547_p10 = pnand %p2546_p9, %p2540_p5 }
 0x27e   : > { %1976 = vmatmul.mubr.f32.vlgmr.msra.gmra.mxu0 %v1908_v44  ;;  %2440 = vmatprep.subr.mxu1 %v3509_v61 }
 0x27f   : > { %2441 = vmatpush3.msra.mxu1 %v1892_v42 }
 0x280   : > { %2443 = vmatmul.mubr.f32.vlgmr.msra.gmra.mxu1 %v1910_v60 }
 0x2d8   : > { %v2216_v2 = vpop.f32.mrf.mxu0 }
 0x2da   : > { %v2217_v29 = vpop.f32.mrf.mxu0 }
 0x2db   : > { %v2218_v25 = vadd.f32 %v2217_v29, %v2216_v2 }
 0x2e0   : > { %v1563_v40 = vpop.f32.mrf.mxu1 }
 0x2e1   : > { %v1564_v52 = vadd.f32 %v2218_v25, %v1563_v40 }
 0x2e2   : > { %v2374_v37 = vpop.f32.mrf.mxu1 }
 0x30b   : > { %v2268_v30 = vpop.f32.mrf.mxu0 }
 0x30d   : > { %v2269_v12 = vpop.f32.mrf.mxu0 }
 0x30e   : > { %v2270_v39 = vadd.f32 %v2269_v12, %v2268_v30 }
 0x310   : > { %v1703_v46 = vpop.f32.mrf.mxu1  ;;  %v1634_v61 = vadd.f32 %v2270_v39, %v1564_v52 }
 0x312   : > { %v2409_v0 = vpop.f32.mrf.mxu1  ;;  %v1704_v58 = vadd.f32 %v1703_v46, %v1634_v61 }
 0x33e   : > { %v2320_v54 = vpop.f32.mrf.mxu0 }
 0x340   : > { %v2321_v5 = vpop.f32.mrf.mxu0  ;;  %v2047_v17 = vpop.f32.mrf.mxu1 }
 0x341   : > { %v2322_v18 = vadd.f32 %v2321_v5, %v2320_v54 }
 0x342   : > { %v2444_v3 = vpop.f32.mrf.mxu1 }
 0x343   : > { %v2048_v62 = vadd.f32 %v2322_v18, %v2047_v17 }
 0x345   : > { %v2051_v8 = vadd.f32 %v2048_v62, %v1704_v58 }
 0x347   : > { %2052 = vst [vmem:[%s3532_s22] sm:$0xff] %v2051_v8 }
 0x348   : > { %2550 = shalt.err (!%p2547_p10)
}
 0x349   : > { %s2551_s16 = scalar_lea.hbm %s2067_s9, 128  ;;  %s2555_s13 = scalar_lea.hbm %s3459_s8, 1024 }
 0x34a   : > { %p2552_p11 = scmp.ne.s32.totalorder %s2067_s9, %s2551_s16  ;;  %p2556_p0 = scmp.lt.s32.totalorder %s2067_s9, %s3459_s8 }
 0x34b   : > { %p2557_p1 = scmp.lt.s32.totalorder %s2555_s13, %s2551_s16 }
 0x34c   : > { %p2553_p12 = pnand %p2552_p11, %p2736_p3 }
 0x34d   : > { %p2558_p2 = por %p2557_p1, %p2556_p0 }
 0x34e   : > { %p2554_p13 = pneg %p2553_p12 }
 0x350   : > { %p2559_p4 = pnand %p2558_p2, %p2554_p13 }
 0x352   : > { %2562 = shalt.err (!%p2559_p4)
}
 0x353   : > { %2445 = dma.vmem_to_hbm [thread:$0]  (%p2736_p3), %s2070_s20, 128, %s2067_s9, %s2054_s30  }
 0x354 PF: > { %p2451_p5 = scmp.ge.s32.totalorder %s2629_s12, 2  ;;  %s2081_s0 = sand.u32 1, %s2601_s27  }
 0x355   : > { %s2082_s14 = scalar_lea.sflag [#allocation5], %s2081_s0 }
 0x356   : > { %p2448_p6 = pnand %p2451_p5, %p2745_p8 }
 0x358   : > { %p2449_p7 = pneg %p2448_p6 }
 0x35a   : > { %2596 = dma.done.wait (%p2449_p7), %s2082_s14, 128  }
 0x35b   : > { %2598 = vsyncadd (%p2449_p7), %s2082_s14, 4294967168  ;;  %s21_s12 = sadd.s32 1, %s2629_s12   ;;  %s3534_s18 = sld [smem:[#allocation7_spill]] }
 0x35c   : > { %p18_p9 = scmp.ge.s32.totalorder %s21_s12, 10   ;;  %s3535_s27 = smov %s2605_s28 }
 0x35d   : > { %s3536_s28 = smov %s2609_s29  ;;  %s3537_s29 = smov %s2754_s23 }
 0x35e   : > { %s3538_s30 = smov %s2621_s10  ;;  %s3539_s9 = smov %s2625_s11 }
 0x35f   : > { %s3540_s10 = smov %s3543_s15  ;;  %20 = sbr.rel (!%p18_p9) target bundleno = 7 (0x7), region = 93 }
 0x361   : > { %s3541_s11 = smov %s3534_s18 }
 0x364   :  { %2087 = vsyncpa [#allocation5], 1 }
 0x365   :  { %2089 = vsyncpa [#allocation5 + $0x1], 1 }

</bundles_post_ra>
